<compile_context>
chip_gen: v7x
topology: tpu7x:2x2x1
jax: 0.10.0
libtpu: 0.0.40
codegen_flags: <defaults>
</compile_context>

<pallas_src>
import functools

import jax
import jax.numpy as jnp
from jax import lax
from jax.experimental import pallas as pl
from jax.experimental.pallas import tpu as pltpu


def _round_up(x, m):
    return (x + m - 1) // m * m


@functools.lru_cache(maxsize=1)
def _prefer_tn256():
    # v6e/v7x MXUs are 256 wide; the v5 generation is 128 wide.
    try:
        kind = jax.devices()[0].device_kind.lower()
        return "v5" not in kind
    except Exception:  # pragma: no cover - conservative fallback
        return True


# ----------------------------------------------------------------------------
# Fused shifted-tap matmul kernel:  out = relu?( sum_t x[off_t:off_t+M] @ w[t] + b )
# Grid = (Cout blocks [parallel], K blocks [reduction]).  The f32 output block
# stays resident in VMEM across the K axis and doubles as the accumulator.
# ----------------------------------------------------------------------------
def _tap_matmul_kernel(x_ref, w_ref, b_ref, o_ref, *, taps, m_out, relu):
    k = pl.program_id(1)

    @pl.when(k == 0)
    def _init():
        o_ref[...] = jnp.zeros_like(o_ref)

    acc = o_ref[...]
    for t, off in enumerate(taps):
        a = x_ref[off:off + m_out, :]                       # (m_out, tk) bf16
        acc = acc + jnp.dot(a, w_ref[t], preferred_element_type=jnp.float32)
    o_ref[...] = acc

    @pl.when(k == pl.num_programs(1) - 1)
    def _finish():
        r = o_ref[...] + b_ref[...]
        if relu:
            r = jnp.maximum(r, 0.0)
        o_ref[...] = r


def _fused_matmul(x2d, w, b, *, taps, m_out, relu):
    """x2d:(m_in,K) bf16, w:(T,K,n_pad) bf16, b:(1,n_true) f32 -> (m_out,n_pad) f32."""
    m_in, K = x2d.shape
    T, Kw, n_pad = w.shape
    assert K == Kw and T == len(taps) and n_pad % 128 == 0
    n_true = b.shape[1]
    bias = b if n_true == n_pad else jnp.pad(b, ((0, 0), (0, n_pad - n_true)))

    if _prefer_tn256() and n_pad % 256 == 0 and n_pad >= 512:
        tn = 256                       # wide layers on v6e/v7x (still >=2 blocks)
    else:
        tn = 128
    if K % 256 == 0:
        tk = 256
    elif K % 128 == 0:
        tk = 128
    else:
        tk = K                         # small / odd K: single reduction block
    grid = (n_pad // tn, K // tk)

    return pl.pallas_call(
        functools.partial(_tap_matmul_kernel, taps=taps, m_out=m_out, relu=relu),
        out_shape=jax.ShapeDtypeStruct((m_out, n_pad), jnp.float32),
        grid_spec=pltpu.PrefetchScalarGridSpec(
            num_scalar_prefetch=0,
            grid=grid,
            in_specs=[
                pl.BlockSpec((m_in, tk), lambda j, k: (0, k)),
                pl.BlockSpec((T, tk, tn), lambda j, k: (0, k, j)),
                pl.BlockSpec((1, tn), lambda j, k: (0, j)),
            ],
            out_specs=pl.BlockSpec((m_out, tn), lambda j, k: (0, j)),
        ),
        compiler_params=pltpu.CompilerParams(
            dimension_semantics=("parallel", "arbitrary"),
        ),
    )(x2d, w, bias)


# ----------------------------------------------------------------------------
# Conv ops built on the fused kernel
# ----------------------------------------------------------------------------
def conv3x3(x, p, relu):
    """3x3 conv, padding=1, + bias (+ReLU).  x:(N,H,W,Cin) f32, NHWC."""
    n, h, w_sp, cin = x.shape
    wm, b = p["w"], p["b"]                  # (9,k_pad,cout_pad) bf16, (1,cout) f32
    k_pad = wm.shape[1]
    cout = b.shape[1]
    hp, wp = h + 2, w_sp + 2
    m_out = n * hp * wp                     # includes some garbage rows (sliced off)
    m_in = m_out + 2 * wp + 2               # tail pad so every tap window is in-bounds
    xp = jnp.pad(x, ((0, 0), (1, 1), (1, 1), (0, k_pad - cin)))
    x2 = jnp.pad(xp.reshape(m_out, k_pad), ((0, m_in - m_out), (0, 0)))
    x2 = x2.astype(jnp.bfloat16)
    taps = tuple(kh * wp + kw for kh in range(3) for kw in range(3))
    out = _fused_matmul(x2, wm, b, taps=taps, m_out=m_out, relu=relu)
    return out.reshape(n, hp, wp, -1)[:, :h, :w_sp, :cout]


def _dense(x2d, p, relu=False):
    """Plain matmul layer (ConvTranspose 2x2 / 1x1 conv) via the same kernel."""
    m, cin = x2d.shape
    wm, b = p["w"], p["b"]
    k_pad = wm.shape[1]
    if k_pad != cin:
        x2d = jnp.pad(x2d, ((0, 0), (0, k_pad - cin)))
    out = _fused_matmul(x2d.astype(jnp.bfloat16), wm, b,
                        taps=(0,), m_out=m, relu=relu)
    return out[:, : b.shape[1]]


def conv_transpose2x2(x, p):
    """ConvTranspose2d kernel=2 stride=2 (weights pre-flattened at init)."""
    n, h, w_sp, cin = x.shape
    cout = p["b"].shape[1] // 4
    out = _dense(x.reshape(n * h * w_sp, cin), p)           # (M, 4*cout)
    out = (out.reshape(n, h, w_sp, 2, 2, cout)
              .transpose(0, 1, 3, 2, 4, 5)
              .reshape(n, 2 * h, 2 * w_sp, cout))
    return out


def conv1x1(x, p):
    n, h, w_sp, cin = x.shape
    out = _dense(x.reshape(n * h * w_sp, cin), p)
    return out.reshape(n, h, w_sp, -1)


def maxpool2x2(x):
    # Pure VPU elementwise max in XLA: a Pallas round trip here only adds HBM
    # traffic + launch overhead for essentially zero compute (perf review).
    return jnp.maximum(
        jnp.maximum(x[:, 0::2, 0::2, :], x[:, 0::2, 1::2, :]),
        jnp.maximum(x[:, 1::2, 0::2, :], x[:, 1::2, 1::2, :]),
    )


# ----------------------------------------------------------------------------
# UNet_concat modules
# ----------------------------------------------------------------------------
def double_conv(x, p):
    x = conv3x3(x, p["c1"], relu=True)
    x = conv3x3(x, p["c2"], relu=True)
    return x


def up_block(x1, x2, p):
    x1 = conv_transpose2x2(x1, p["up"])
    dy = x2.shape[1] - x1.shape[1]
    dx = x2.shape[2] - x1.shape[2]
    x1 = jnp.pad(x1, ((0, 0), (dy // 2, dy - dy // 2),
                      (dx // 2, dx - dx // 2), (0, 0)))
    return double_conv(jnp.concatenate([x2, x1], axis=-1), p["dc"])


def unet_concat_forward(params, x, l5, l4, l3, l2):
    to_nhwc = lambda t: jnp.transpose(t, (0, 2, 3, 1))
    x, l5, l4, l3, l2 = map(to_nhwc, (x, l5, l4, l3, l2))

    x1 = double_conv(x, params["inc"])
    x2 = double_conv(maxpool2x2(x1), params["down1"])
    x3 = double_conv(maxpool2x2(x2), params["down2"])
    x4 = double_conv(maxpool2x2(x3), params["down3"])
    x5 = double_conv(maxpool2x2(x4), params["down4"])

    m5 = jnp.concatenate([x5, l5], axis=-1)
    m4 = jnp.concatenate([x4, l4], axis=-1)
    m3 = jnp.concatenate([x3, l3], axis=-1)
    m2 = jnp.concatenate([x2, l2], axis=-1)

    u = up_block(m5, m4, params["up1"])
    u = up_block(u, m3, params["up2"])
    u = up_block(u, m2, params["up3"])
    u = up_block(u, x1, params["up4"])

    out = conv1x1(u, params["outc"])
    return jnp.transpose(out, (0, 3, 1, 2))                  # back to NCHW


# ----------------------------------------------------------------------------
# Parameter init (torch layouts) + one-time prep into kernel-ready layouts
# (bf16, (taps, K, Cout_pad), lane-aligned) so no per-forward weight reshuffle.
# ----------------------------------------------------------------------------
def _init_conv(key, cout, cin, k):
    k1, k2 = jax.random.split(key)
    fan_in = cin * k * k
    w = jax.random.normal(k1, (cout, cin, k, k), jnp.float32) / jnp.sqrt(fan_in)
    b = 0.01 * jax.random.normal(k2, (cout,), jnp.float32)
    return w, b


def _init_convT(key, cin, cout):
    k1, k2 = jax.random.split(key)
    w = jax.random.normal(k1, (cin, cout, 2, 2), jnp.float32) / jnp.sqrt(cin * 4)
    b = 0.01 * jax.random.normal(k2, (cout,), jnp.float32)
    return w, b


def _prep_conv3x3(w, b):
    cout, cin = w.shape[0], w.shape[1]
    k_pad = cin if cin >= 128 else 128
    cout_pad = _round_up(cout, 128)
    wm = jnp.transpose(w, (2, 3, 1, 0)).reshape(9, cin, cout)
    wm = jnp.pad(wm, ((0, 0), (0, k_pad - cin), (0, cout_pad - cout)))
    return {"w": wm.astype(jnp.bfloat16),
            "b": b.reshape(1, cout).astype(jnp.float32)}


def _prep_convT(w, b):
    cin, cout = w.shape[0], w.shape[1]
    n_full = 4 * cout
    n_pad = _round_up(n_full, 128)
    k_pad = cin if cin >= 128 else 128
    wm = jnp.transpose(w, (0, 2, 3, 1)).reshape(cin, n_full)
    wm = jnp.pad(wm, ((0, k_pad - cin), (0, n_pad - n_full)))[None]
    bm = jnp.tile(b, 4).reshape(1, n_full)
    return {"w": wm.astype(jnp.bfloat16), "b": bm.astype(jnp.float32)}


def _prep_conv1x1(w, b):
    cout, cin = w.shape[0], w.shape[1]
    k_pad = cin if cin >= 128 else 128
    cout_pad = _round_up(cout, 128)
    wm = jnp.pad(w.reshape(cout, cin).T,
                 ((0, k_pad - cin), (0, cout_pad - cout)))[None]
    return {"w": wm.astype(jnp.bfloat16),
            "b": b.reshape(1, cout).astype(jnp.float32)}


def _make_double_conv(key, cin, cout):
    k1, k2 = jax.random.split(key)
    w1, b1 = _init_conv(k1, cout, cin, 3)
    w2, b2 = _init_conv(k2, cout, cout, 3)
    return {"c1": _prep_conv3x3(w1, b1), "c2": _prep_conv3x3(w2, b2)}


def _make_up(key, cin, skip, cout):
    k1, k2 = jax.random.split(key)
    wt, bt = _init_convT(k1, cin, cout)
    return {"up": _prep_convT(wt, bt),
            "dc": _make_double_conv(k2, cout + skip, cout)}


def init_params(key, in_channels=1, out_channels=1):
    keys = jax.random.split(key, 10)
    params = {
        "inc": _make_double_conv(keys[0], in_channels, 64),
        "down1": _make_double_conv(keys[1], 64, 128),
        "down2": _make_double_conv(keys[2], 128, 256),
        "down3": _make_double_conv(keys[3], 256, 512),
        "down4": _make_double_conv(keys[4], 512, 1024),
        "up1": _make_up(keys[5], 1024 + 256, 512 + 128, 512 + 128),
        "up2": _make_up(keys[6], 512 + 128, 256 + 64, 256 + 64),
        "up3": _make_up(keys[7], 256 + 64, 128 + 32, 128 + 32),
        "up4": _make_up(keys[8], 128 + 32, 64, 64),
    }
    kw, _ = jax.random.split(keys[9])
    w, b = _init_conv(kw, out_channels, 64, 1)
    params["outc"] = _prep_conv1x1(w, b)
    return params


# ----------------------------------------------------------------------------
if __name__ == "__main__":
    key = jax.random.PRNGKey(0)
    pkey, ckey, *ikeys = jax.random.split(key, 8)

    # Quick correctness check of the in-kernel 9-tap conv (exercises both the
    # Cin and Cout padding paths) against an f32 XLA reference.
    ck1, ck2 = jax.random.split(ckey)
    cw, cb = _init_conv(ck1, 80, 48, 3)
    cx = jax.random.normal(ck2, (2, 8, 8, 48), jnp.float32)
    got = conv3x3(cx, _prep_conv3x3(cw, cb), relu=False)
    ref = lax.conv_general_dilated(
        cx, jnp.transpose(cw, (2, 3, 1, 0)), (1, 1), "SAME",
        dimension_numbers=("NHWC", "HWIO", "NHWC"),
        precision=lax.Precision.HIGHEST) + cb
    err = float(jnp.max(jnp.abs(got - ref)))
    assert err < 5e-2, f"conv3x3 mismatch: max abs err = {err}"

    params = init_params(pkey, in_channels=1, out_channels=1)

    B, H, W = 2, 16, 16
    x = jax.random.normal(ikeys[0], (B, 1, H, W), jnp.float32)
    l5 = jax.random.normal(ikeys[1], (B, 256, H // 16, W // 16), jnp.float32)
    l4 = jax.random.normal(ikeys[2], (B, 128, H // 8, W // 8), jnp.float32)
    l3 = jax.random.normal(ikeys[3], (B, 64, H // 4, W // 4), jnp.float32)
    l2 = jax.random.normal(ikeys[4], (B, 32, H // 2, W // 2), jnp.float32)

    fwd = jax.jit(unet_concat_forward)
    out = jax.block_until_ready(fwd(params, x, l5, l4, l3, l2))

    assert out.shape == (B, 1, H, W), out.shape
    assert bool(jnp.all(jnp.isfinite(out)))
    print("KERNEL_OK")
</pallas_src>

<mosaic_0001>
module attributes {stable_mosaic.version = 11 : i64} {
  func.func @_tap_matmul_kernel(%arg0: i32, %arg1: i32, %arg2: memref<222x128xbf16, #tpu.memory_space<vmem>>, %arg3: memref<9x128x128xbf16, #tpu.memory_space<vmem>>, %arg4: memref<1x128xf32, #tpu.memory_space<vmem>>, %arg5: memref<200x128xf32, #tpu.memory_space<vmem>>) attributes {dimension_semantics = [#tpu.dimension_semantics<parallel>, #tpu.dimension_semantics<arbitrary>], iteration_bounds = array<i64: 1, 1>, scalar_prefetch = 0 : i64, scratch_operands = 0 : i64, tpu.core_type = #tpu.core_type<tc>, window_params = [{transform_indices = @transform_0, window_bounds = array<i64: 222, 128>}, {transform_indices = @transform_1, window_bounds = array<i64: 9, 128, 128>}, {transform_indices = @transform_2, window_bounds = array<i64: 1, 128>}, {transform_indices = @transform_3, window_bounds = array<i64: 200, 128>}]} {
    %c0_i32 = arith.constant 0 : i32
    %0 = arith.cmpi eq, %arg1, %c0_i32 : i32
    %1 = arith.extui %0 : i1 to i32
    %c0_i32_0 = arith.constant 0 : i32
    %2 = arith.cmpi ne, %1, %c0_i32_0 : i32
    scf.if %2 {
      %cst_45 = arith.constant 0.000000e+00 : f32
      %53 = vector.broadcast %cst_45 : f32 to vector<200x128xf32>
      %c0_46 = arith.constant 0 : index
      %c0_47 = arith.constant 0 : index
      %54 = vector.load %arg5[%c0_46, %c0_47] : memref<200x128xf32, #tpu.memory_space<vmem>>, vector<200x128xf32>
      tpu.vector_store %arg5[%c0_46, %c0_47], %53 {strides = array<i32>} : memref<200x128xf32, #tpu.memory_space<vmem>>, vector<200x128xf32>,
    } else {
    }
    %c0 = arith.constant 0 : index
    %c0_1 = arith.constant 0 : index
    %3 = vector.load %arg5[%c0, %c0_1] : memref<200x128xf32, #tpu.memory_space<vmem>>, vector<200x128xf32>
    %c0_2 = arith.constant 0 : index
    %c0_3 = arith.constant 0 : index
    %4 = vector.load %arg2[%c0_2, %c0_3] : memref<222x128xbf16, #tpu.memory_space<vmem>>, vector<200x128xbf16>
    %c0_4 = arith.constant 0 : index
    %c0_5 = arith.constant 0 : index
    %c0_6 = arith.constant 0 : index
    %5 = vector.load %arg3[%c0_4, %c0_5, %c0_6] : memref<9x128x128xbf16, #tpu.memory_space<vmem>>, vector<1x128x128xbf16>
    %6 = vector.shape_cast %5 : vector<1x128x128xbf16> to vector<128x128xbf16>
    %cst = arith.constant dense<0.000000e+00> : vector<200x128xf32>
    %7 = tpu.matmul %4, %6, %cst {dimension_numbers = #tpu.dot_dimension_numbers<[1], [0], [0], [1], [0, 0, 1, 1], [], []>} : vector<200x128xbf16>, vector<128x128xbf16>, vector<200x128xf32> -> vector<200x128xf32>
    %8 = arith.addf %3, %7 : vector<200x128xf32>
    %c1 = arith.constant 1 : index
    %c0_7 = arith.constant 0 : index
    %9 = vector.load %arg2[%c1, %c0_7] : memref<222x128xbf16, #tpu.memory_space<vmem>>, vector<200x128xbf16>
    %c1_8 = arith.constant 1 : index
    %c0_9 = arith.constant 0 : index
    %c0_10 = arith.constant 0 : index
    %10 = vector.load %arg3[%c1_8, %c0_9, %c0_10] : memref<9x128x128xbf16, #tpu.memory_space<vmem>>, vector<1x128x128xbf16>
    %11 = vector.shape_cast %10 : vector<1x128x128xbf16> to vector<128x128xbf16>
    %cst_11 = arith.constant dense<0.000000e+00> : vector<200x128xf32>
    %12 = tpu.matmul %9, %11, %cst_11 {dimension_numbers = #tpu.dot_dimension_numbers<[1], [0], [0], [1], [0, 0, 1, 1], [], []>} : vector<200x128xbf16>, vector<128x128xbf16>, vector<200x128xf32> -> vector<200x128xf32>
    %13 = arith.addf %8, %12 : vector<200x128xf32>
    %c2 = arith.constant 2 : index
    %c0_12 = arith.constant 0 : index
    %14 = vector.load %arg2[%c2, %c0_12] : memref<222x128xbf16, #tpu.memory_space<vmem>>, vector<200x128xbf16>
    %c2_13 = arith.constant 2 : index
    %c0_14 = arith.constant 0 : index
    %c0_15 = arith.constant 0 : index
    %15 = vector.load %arg3[%c2_13, %c0_14, %c0_15] : memref<9x128x128xbf16, #tpu.memory_space<vmem>>, vector<1x128x128xbf16>
    %16 = vector.shape_cast %15 : vector<1x128x128xbf16> to vector<128x128xbf16>
    %cst_16 = arith.constant dense<0.000000e+00> : vector<200x128xf32>
    %17 = tpu.matmul %14, %16, %cst_16 {dimension_numbers = #tpu.dot_dimension_numbers<[1], [0], [0], [1], [0, 0, 1, 1], [], []>} : vector<200x128xbf16>, vector<128x128xbf16>, vector<200x128xf32> -> vector<200x128xf32>
    %18 = arith.addf %13, %17 : vector<200x128xf32>
    %c10 = arith.constant 10 : index
    %c0_17 = arith.constant 0 : index
    %19 = vector.load %arg2[%c10, %c0_17] : memref<222x128xbf16, #tpu.memory_space<vmem>>, vector<200x128xbf16>
    %c3 = arith.constant 3 : index
    %c0_18 = arith.constant 0 : index
    %c0_19 = arith.constant 0 : index
    %20 = vector.load %arg3[%c3, %c0_18, %c0_19] : memref<9x128x128xbf16, #tpu.memory_space<vmem>>, vector<1x128x128xbf16>
    %21 = vector.shape_cast %20 : vector<1x128x128xbf16> to vector<128x128xbf16>
    %cst_20 = arith.constant dense<0.000000e+00> : vector<200x128xf32>
    %22 = tpu.matmul %19, %21, %cst_20 {dimension_numbers = #tpu.dot_dimension_numbers<[1], [0], [0], [1], [0, 0, 1, 1], [], []>} : vector<200x128xbf16>, vector<128x128xbf16>, vector<200x128xf32> -> vector<200x128xf32>
    %23 = arith.addf %18, %22 : vector<200x128xf32>
    %c11 = arith.constant 11 : index
    %c0_21 = arith.constant 0 : index
    %24 = vector.load %arg2[%c11, %c0_21] : memref<222x128xbf16, #tpu.memory_space<vmem>>, vector<200x128xbf16>
    %c4 = arith.constant 4 : index
    %c0_22 = arith.constant 0 : index
    %c0_23 = arith.constant 0 : index
    %25 = vector.load %arg3[%c4, %c0_22, %c0_23] : memref<9x128x128xbf16, #tpu.memory_space<vmem>>, vector<1x128x128xbf16>
    %26 = vector.shape_cast %25 : vector<1x128x128xbf16> to vector<128x128xbf16>
    %cst_24 = arith.constant dense<0.000000e+00> : vector<200x128xf32>
    %27 = tpu.matmul %24, %26, %cst_24 {dimension_numbers = #tpu.dot_dimension_numbers<[1], [0], [0], [1], [0, 0, 1, 1], [], []>} : vector<200x128xbf16>, vector<128x128xbf16>, vector<200x128xf32> -> vector<200x128xf32>
    %28 = arith.addf %23, %27 : vector<200x128xf32>
    %c12 = arith.constant 12 : index
    %c0_25 = arith.constant 0 : index
    %29 = vector.load %arg2[%c12, %c0_25] : memref<222x128xbf16, #tpu.memory_space<vmem>>, vector<200x128xbf16>
    %c5 = arith.constant 5 : index
    %c0_26 = arith.constant 0 : index
    %c0_27 = arith.constant 0 : index
    %30 = vector.load %arg3[%c5, %c0_26, %c0_27] : memref<9x128x128xbf16, #tpu.memory_space<vmem>>, vector<1x128x128xbf16>
    %31 = vector.shape_cast %30 : vector<1x128x128xbf16> to vector<128x128xbf16>
    %cst_28 = arith.constant dense<0.000000e+00> : vector<200x128xf32>
    %32 = tpu.matmul %29, %31, %cst_28 {dimension_numbers = #tpu.dot_dimension_numbers<[1], [0], [0], [1], [0, 0, 1, 1], [], []>} : vector<200x128xbf16>, vector<128x128xbf16>, vector<200x128xf32> -> vector<200x128xf32>
    %33 = arith.addf %28, %32 : vector<200x128xf32>
    %c20 = arith.constant 20 : index
    %c0_29 = arith.constant 0 : index
    %34 = vector.load %arg2[%c20, %c0_29] : memref<222x128xbf16, #tpu.memory_space<vmem>>, vector<200x128xbf16>
    %c6 = arith.constant 6 : index
    %c0_30 = arith.constant 0 : index
    %c0_31 = arith.constant 0 : index
    %35 = vector.load %arg3[%c6, %c0_30, %c0_31] : memref<9x128x128xbf16, #tpu.memory_space<vmem>>, vector<1x128x128xbf16>
    %36 = vector.shape_cast %35 : vector<1x128x128xbf16> to vector<128x128xbf16>
    %cst_32 = arith.constant dense<0.000000e+00> : vector<200x128xf32>
    %37 = tpu.matmul %34, %36, %cst_32 {dimension_numbers = #tpu.dot_dimension_numbers<[1], [0], [0], [1], [0, 0, 1, 1], [], []>} : vector<200x128xbf16>, vector<128x128xbf16>, vector<200x128xf32> -> vector<200x128xf32>
    %38 = arith.addf %33, %37 : vector<200x128xf32>
    %c21 = arith.constant 21 : index
    %c0_33 = arith.constant 0 : index
    %39 = vector.load %arg2[%c21, %c0_33] : memref<222x128xbf16, #tpu.memory_space<vmem>>, vector<200x128xbf16>
    %c7 = arith.constant 7 : index
    %c0_34 = arith.constant 0 : index
    %c0_35 = arith.constant 0 : index
    %40 = vector.load %arg3[%c7, %c0_34, %c0_35] : memref<9x128x128xbf16, #tpu.memory_space<vmem>>, vector<1x128x128xbf16>
    %41 = vector.shape_cast %40 : vector<1x128x128xbf16> to vector<128x128xbf16>
    %cst_36 = arith.constant dense<0.000000e+00> : vector<200x128xf32>
    %42 = tpu.matmul %39, %41, %cst_36 {dimension_numbers = #tpu.dot_dimension_numbers<[1], [0], [0], [1], [0, 0, 1, 1], [], []>} : vector<200x128xbf16>, vector<128x128xbf16>, vector<200x128xf32> -> vector<200x128xf32>
    %43 = arith.addf %38, %42 : vector<200x128xf32>
    %c22 = arith.constant 22 : index
    %c0_37 = arith.constant 0 : index
    %44 = vector.load %arg2[%c22, %c0_37] : memref<222x128xbf16, #tpu.memory_space<vmem>>, vector<200x128xbf16>
    %c8 = arith.constant 8 : index
    %c0_38 = arith.constant 0 : index
    %c0_39 = arith.constant 0 : index
    %45 = vector.load %arg3[%c8, %c0_38, %c0_39] : memref<9x128x128xbf16, #tpu.memory_space<vmem>>, vector<1x128x128xbf16>
    %46 = vector.shape_cast %45 : vector<1x128x128xbf16> to vector<128x128xbf16>
    %cst_40 = arith.constant dense<0.000000e+00> : vector<200x128xf32>
    %47 = tpu.matmul %44, %46, %cst_40 {dimension_numbers = #tpu.dot_dimension_numbers<[1], [0], [0], [1], [0, 0, 1, 1], [], []>} : vector<200x128xbf16>, vector<128x128xbf16>, vector<200x128xf32> -> vector<200x128xf32>
    %48 = arith.addf %43, %47 : vector<200x128xf32>
    %c0_41 = arith.constant 0 : index
    %c0_42 = arith.constant 0 : index
    %49 = vector.load %arg5[%c0_41, %c0_42] : memref<200x128xf32, #tpu.memory_space<vmem>>, vector<200x128xf32>
    tpu.vector_store %arg5[%c0_41, %c0_42], %48 {strides = array<i32>} : memref<200x128xf32, #tpu.memory_space<vmem>>, vector<200x128xf32>,
    %c0_i32_43 = arith.constant 0 : i32
    %50 = arith.cmpi eq, %arg1, %c0_i32_43 : i32
    %51 = arith.extui %50 : i1 to i32
    %c0_i32_44 = arith.constant 0 : i32
    %52 = arith.cmpi ne, %51, %c0_i32_44 : i32
    scf.if %52 {
      %c0_45 = arith.constant 0 : index
      %c0_46 = arith.constant 0 : index
      %53 = vector.load %arg5[%c0_45, %c0_46] : memref<200x128xf32, #tpu.memory_space<vmem>>, vector<200x128xf32>
      %c0_47 = arith.constant 0 : index
      %c0_48 = arith.constant 0 : index
      %54 = vector.load %arg4[%c0_47, %c0_48] : memref<1x128xf32, #tpu.memory_space<vmem>>, vector<1x128xf32>
      %55 = vector.broadcast %54 : vector<1x128xf32> to vector<200x128xf32>
      %56 = arith.addf %53, %55 : vector<200x128xf32>
      %c0_49 = arith.constant 0 : index
      %c0_50 = arith.constant 0 : index
      %57 = vector.load %arg5[%c0_49, %c0_50] : memref<200x128xf32, #tpu.memory_space<vmem>>, vector<200x128xf32>
      tpu.vector_store %arg5[%c0_49, %c0_50], %56 {strides = array<i32>} : memref<200x128xf32, #tpu.memory_space<vmem>>, vector<200x128xf32>,
    } else {
    }
    return
  }
  func.func @transform_0(%arg0: i32, %arg1: i32) -> (i32, i32) {
    %c0_i32 = arith.constant 0 : i32
    %c0_i32_0 = arith.constant 0 : i32
    return %c0_i32, %arg1 : i32, i32
  }
  func.func @transform_1(%arg0: i32, %arg1: i32) -> (i32, i32, i32) {
    %c0_i32 = arith.constant 0 : i32
    %c0_i32_0 = arith.constant 0 : i32
    return %c0_i32, %arg1, %arg0 : i32, i32, i32
  }
  func.func @transform_2(%arg0: i32, %arg1: i32) -> (i32, i32) {
    %c0_i32 = arith.constant 0 : i32
    %c0_i32_0 = arith.constant 0 : i32
    return %c0_i32, %arg0 : i32, i32
  }
  func.func @transform_3(%arg0: i32, %arg1: i32) -> (i32, i32) {
    %c0_i32 = arith.constant 0 : i32
    %c0_i32_0 = arith.constant 0 : i32
    return %c0_i32, %arg0 : i32, i32
  }
}

</mosaic_0001>

<bundles_post_ra>
// kernel: tpu_custom_call.1
= control target key start
LH: loop header
LB: loop body
LE: loop exit
PB: predicated region body
PF: predicated region fallthrough
CT: control target
= control target key end

     0   :  { %8 = vsyncpa [#allocation3], 0  ;;  %s5374_s0 = inlined_call_operand.hbm [shape: bf16[222,128], index: 0, kind: input, shape index: {}]   ;;  %s5375_s1 = inlined_call_operand.hbm [shape: bf16[9,128,128], index: 1, kind: input, shape index: {}]   ;;  %s5376_s2 = inlined_call_operand.vmem [shape: f32[1,128], index: 2, kind: input, shape index: {}]   ;;  %s5377_s3 = inlined_call_operand.hbm [shape: f32[200,128], index: 3, kind: output, shape index: {}]  }
   0x1   :  { %9 = vsyncpa [#allocation6], 0 }
   0x2   :  { %10 = vsyncpa [#allocation4], 0  ;;  %s4380_s12 = smov [#allocation2]   ;;  %s4308_s16 = scalar_lea.hbm %s5374_s0, 1792 }
   0x3   :  { %s16_s13 = sshll.u32 %s4380_s12, 4  ;;  %p4309_p0 = scmp.ne.s32.totalorder %s5374_s0, %s4308_s16  ;;  %s17_s13 = int_to_ptr.vmem [resolvable:$true] %s16_s13 }
   0x4   :  { %p4312_p1 = scmp.lt.u32.totalorder %s4308_s16, %s5374_s0 }
   0x6   :  { %p4314_p2 = pnand %p4312_p1, %p4309_p0 }
   0x8   :  { %4317 = shalt.err (!%p4314_p2)
}
   0x9   :  { %s4318_s21 = scalar_lea.vmem %s17_s13, 1792  ;;  %p4323_p4 = scmp.lt.s32.totalorder %s17_s13, %s17_s13 }
   0xa   :  { %p4319_p3 = scmp.ne.s32.totalorder %s17_s13, %s4318_s21  ;;  %p4324_p5 = scmp.lt.s32.totalorder %s4318_s21, %s4318_s21 }
   0xc   :  { %p4325_p6 = por %p4324_p5, %p4323_p4 }
   0xe   :  { %p4326_p7 = pnand %p4325_p6, %p4319_p3 }
  0x10   :  { %4329 = shalt.err (!%p4326_p7)
}
  0x11   :  { %s4381_s22 = smov 64   ;;  %s4382_s23 = smov 4  }
  0x12   :  { %22 = dma.hbm_to_vmem [thread:$0]  %s5374_s0, 1792, %s17_s13, [#allocation3], %s4381_s22, %s4381_s22, %s4382_s23  }
  0x13   :  { %s4383_s26 = smov [#allocation5]   ;;  %s4330_s30 = scalar_lea.hbm %s5375_s1, 9216 }
  0x14   :  { %s28_s27 = sshll.u32 %s4383_s26, 4  ;;  %p4331_p8 = scmp.ne.s32.totalorder %s5375_s1, %s4330_s30  ;;  %s29_s27 = int_to_ptr.vmem [resolvable:$true] %s28_s27 }
  0x15   :  { %p4334_p9 = scmp.lt.u32.totalorder %s4330_s30, %s5375_s1 }
  0x17   :  { %p4336_p10 = pnand %p4334_p9, %p4331_p8 }
  0x19   :  { %4339 = shalt.err (!%p4336_p10)
}
  0x1a   :  { %s4340_s8 = scalar_lea.vmem %s29_s27, 9216  ;;  %p4345_p12 = scmp.lt.s32.totalorder %s29_s27, %s29_s27 }
  0x1b   :  { %p4341_p11 = scmp.ne.s32.totalorder %s29_s27, %s4340_s8  ;;  %p4346_p13 = scmp.lt.s32.totalorder %s4340_s8, %s4340_s8 }
  0x1d   :  { %p4347_p0 = por %p4346_p13, %p4345_p12 }
  0x1f   :  { %p4348_p1 = pnand %p4347_p0, %p4341_p11 }
  0x21   :  { %4351 = shalt.err (!%p4348_p1)
}
  0x22   :  { %34 = dma.hbm_to_vmem [thread:$0]  %s5375_s1, 9216, %s29_s27, [#allocation6], %s4381_s22, %s4381_s22, %s4382_s23  }
  0x23   :  { %4374 = dma.done.wait [#allocation3], 1792  }
  0x24   :  { %4375 = vsyncadd [#allocation3], 4294965504 }
  0x25   :  { %4376 = dma.done.wait [#allocation6], 9216  }
  0x26   :  { %4377 = vsyncadd [#allocation6], 4294958080  ;;  %v4384_v0 = vmov 0.0   ;;  %vm4385_vm0 = vmmov 0   ;;  %v4179_v1 = vld [vmem:[#allocation5] sm:$0xff]   ;;  %v4180_v2 = vld [vmem:[#allocation5 + $0x8] sm:$0xff]  }
  0x27   :  { %3542 = vmatprep.subr.bf16.mxu0 %v4384_v0  ;;  %4154 = vmatprep.subr.bf16.mxu1 %v4384_v0  ;;  %v4181_v3 = vld [vmem:[#allocation5 + $0x10] sm:$0xff]   ;;  %v4182_v4 = vld [vmem:[#allocation5 + $0x18] sm:$0xff]   ;;  %v4183_v5 = vld [vmem:[#allocation5 + $0x20] sm:$0xff]   ;;  %vm532_vm1 = vsmask.f32 7424  ;;  %vm879_vm2 = vcmask 1046528  }
  0x28   :  { %3558 = vmatprep.mubr.msk.bf16.mxu0 %vm4385_vm0, %v4384_v0  ;;  %3586 = vmatprep.mubr.msk.bf16.mxu1 %vm4385_vm0, %v4384_v0  ;;  %v4184_v6 = vld [vmem:[#allocation5 + $0x28] sm:$0xff]   ;;  %v4185_v7 = vld [vmem:[#allocation5 + $0x30] sm:$0xff]   ;;  %v4186_v8 = vld [vmem:[#allocation5 + $0x38] sm:$0xff]   ;;  %vm1503_vm3 = vsmask.f32 6400  ;;  %vm1863_vm4 = vcmask 1045504  }
  0x29   :  { %3543 = vmatpush3.bf16.msra.mxu0 %v4179_v1  ;;  %4162 = vmatpush3.bf16.msra.mxu1 %v4179_v1  ;;  %v4187_v9 = vld [vmem:[#allocation2] sm:$0xff]   ;;  %v4188_v10 = vld [vmem:[#allocation2 + $0x38] sm:$0xff]   ;;  %v4189_v11 = vld [vmem:[#allocation5 + $0x80] sm:$0xff]   ;;  %vm2487_vm5 = vsmask.f32 5376  ;;  %vm2847_vm6 = vcmask 1044480  }
  0x2a   :  { %3544 = vmatprep.subr.bf16.mxu0 %v4384_v0  ;;  %4155 = vmatprep.subr.bf16.mxu1 %v4384_v0  ;;  %v4190_v12 = vld [vmem:[#allocation5 + $0x40] sm:$0xff]   ;;  %v4193_v13 = vld [vmem:[#allocation5 + $0x88] sm:$0xff]   ;;  %v4191_v15 = vld [vmem:[#allocation2 + $0x8] sm:$0xff]  }
  0x2b   :  { %v4194_v14 = vld [vmem:[#allocation5 + $0x48] sm:$0xff]   ;;  %v4192_v16 = vld [vmem:[#allocation2 + $0x40] sm:$0xff]   ;;  %v4199_v19 = vld [vmem:[#allocation5 + $0x98] sm:$0xff]  }
  0x2c   :  { %v4195_v17 = vld [vmem:[#allocation5 + $0x90] sm:$0xff]   ;;  %v4202_v20 = vld [vmem:[#allocation5 + $0x58] sm:$0xff]   ;;  %v4196_v21 = vld [vmem:[#allocation2 + $0x10] sm:$0xff]  }
  0x2d   :  { %3545 = vmatpush3.bf16.msra.mxu0 %v4180_v2  ;;  %4163 = vmatpush3.bf16.msra.mxu1 %v4180_v2  ;;  %v4198_v18 = vld [vmem:[#allocation5 + $0x50] sm:$0xff]   ;;  %v4197_v22 = vld [vmem:[#allocation2 + $0x48] sm:$0xff]   ;;  %v4203_v23 = vld [vmem:[#allocation5 + $0xa0] sm:$0xff]  }
  0x2e   :  { %3546 = vmatprep.subr.bf16.mxu0 %v4384_v0  ;;  %4156 = vmatprep.subr.bf16.mxu1 %v4384_v0  ;;  %v4204_v24 = vld [vmem:[#allocation5 + $0x60] sm:$0xff]   ;;  %v4207_v25 = vld [vmem:[#allocation5 + $0xa8] sm:$0xff]   ;;  %v4211_v29 = vld [vmem:[#allocation5 + $0x70] sm:$0xff]  }
  0x2f   :  { %v4208_v26 = vld [vmem:[#allocation5 + $0x68] sm:$0xff]   ;;  %v4201_v28 = vld [vmem:[#allocation2 + $0x50] sm:$0xff]   ;;  %v4212_v30 = vld [vmem:[#allocation5 + $0xb0] sm:$0xff]  }
  0x30   :  { %v4200_v27 = vld [vmem:[#allocation2 + $0x18] sm:$0xff]   ;;  %v4213_v31 = vld [vmem:[#allocation5 + $0x78] sm:$0xff]   ;;  %v424_v32 = vld [vmem:[#allocation2] sm:$0xf] }
  0x31   :  { %3547 = vmatpush3.bf16.msra.mxu0 %v4181_v3  ;;  %4164 = vmatpush3.bf16.msra.mxu1 %v4181_v3  ;;  %v425_v33 = vld [vmem:[#allocation2 + $0x4] sm:$0xf]  ;;  %v4217_v34 = vld [vmem:[#allocation5 + $0xb8] sm:$0xff]   ;;  %v4206_v36 = vld [vmem:[#allocation2 + $0x58] sm:$0xff]  }
  0x32   :  { %3548 = vmatprep.subr.bf16.mxu0 %v4384_v0  ;;  %4157 = vmatprep.subr.bf16.mxu1 %v4384_v0  ;;  %v4205_v35 = vld [vmem:[#allocation2 + $0x20] sm:$0xff]   ;;  %v3244_v37 = vcombine.low %v424_v32, %v425_v33  ;;  %v4491_v38 = vld [vmem:[#allocation2 + $0x8] sm:$0xff]   ;;  %v4494_v45 = vld [vmem:[#allocation2 + $0x10] sm:$0xff]  }
  0x33   :  { %v4209_v40 = vld [vmem:[#allocation2 + $0x28] sm:$0xff]   ;;  %v4210_v41 = vld [vmem:[#allocation2 + $0x60] ss:$0 sps:$4 sm:$0xff]   ;;  %v541_v44 = vshll.u32 %v4491_v38, 16  ;;  %v858_v48 = vld [vmem:[#allocation2] sm:$0xe] }
  0x34   :  { %v536_v39 = vshll.u32 %v3244_v37, 16  ;;  %v534_v42 = vshrl.u32 %v3244_v37, 16  ;;  %v4214_v49 = vld [vmem:[#allocation2 + $0x30] sm:$0xff]   ;;  %v545_v50 = vshrl.u32 %v4491_v38, 16  ;;  %v549_v51 = vshll.u32 %v4494_v45, 16  ;;  %v4503_v55 = vld [vmem:[#allocation2 + $0x18] sm:$0xff]  }
  0x35   :  { %3549 = vmatpush3.bf16.msra.mxu0 %v4182_v4  ;;  %4165 = vmatpush3.bf16.msra.mxu1 %v4182_v4  ;;  %v543_v47 = vrot.slane %v541_v44, 1  ;;  %v3265_v53 = vcombine.low %v858_v48, %v425_v33  ;;  %v4218_v54 = vld [vmem:[#allocation5 + $0xc0] sm:$0xff]   ;;  %v881_v59 = vrot.slane %v4491_v38, 1  ;;  %v4223_v60 = vld [vmem:[#allocation5 + $0xc8] sm:$0xff]   ;;  %v553_v62 = vshrl.u32 %v4494_v45, 16  ;;  %v4515_v3 = vld [vmem:[#allocation2 + $0x20] sm:$0xff]  }
  0x36   :  { %3550 = vmatprep.subr.bf16.mxu0 %v4384_v0  ;;  %4158 = vmatprep.subr.bf16.mxu1 %v4384_v0  ;;  %v538_v43 = vrot.slane %v536_v39, 1  ;;  %v551_v57 = vrot.slane %v549_v51, 1  ;;  %v4221_v61 = vld [vmem:[#allocation5 + $0x100] sm:$0xff]   ;;  %v557_v63 = vshll.u32 %v4503_v55, 16  ;;  %v4227_v4 = vld [vmem:[#allocation5 + $0xd0] sm:$0xff]   ;;  %v4239_v32 = vld [vmem:[#allocation5 + $0x128] sm:$0xff]  }
  0x37   :  { %v547_v56 = vor.u32 %v545_v50, %v543_v47  ;;  %v880_v58 = vrot.slane %v3265_v53, 1  ;;  %v4242_v37 = vld [vmem:[#allocation5 + $0x130] sm:$0xff]  }
  0x38   :  { %v539_v46 = vor.u32 %v538_v43, %v534_v42  ;;  %v4245_v43 = vld [vmem:[#allocation5 + $0x138] sm:$0xff]   ;;  %v4233_v51 = vld [vmem:[#allocation2 + $0x40] sm:$0xff]  }
  0x39   :  { %3551 = vmatpush3.bf16.msra.mxu0 %v4183_v5  ;;  %4166 = vmatpush3.bf16.msra.mxu1 %v4183_v5  ;;  %v552_v1 = vsel %vm532_vm1, %v547_v56, %v551_v57  ;;  %v882_v2 = vsel %vm879_vm2, %v880_v58, %v881_v59  ;;  %v555_v5 = vor.u32 %v553_v62, %v551_v57  ;;  %v601_v62 = vshrl.u32 %v4233_v51, 16 }
  0x3a   :  { %3552 = vmatprep.subr.bf16.mxu0 %v4384_v0  ;;  %4159 = vmatprep.subr.bf16.mxu1 %v4384_v0  ;;  %v544_v52 = vsel %vm532_vm1, %v539_v46, %v543_v47 }
  0x3d   :  { %3553 = vmatpush3.bf16.msra.mxu0 %v4184_v6  ;;  %4167 = vmatpush3.bf16.msra.mxu1 %v4184_v6  ;;  %v559_v6 = vrot.slane %v557_v63, 1 }
  0x3e   :  { %3554 = vmatprep.subr.bf16.mxu0 %v4384_v0  ;;  %4160 = vmatprep.subr.bf16.mxu1 %v4384_v0 }
  0x41   :  { %3555 = vmatpush3.bf16.msra.mxu0 %v4185_v7  ;;  %4168 = vmatpush3.bf16.msra.mxu1 %v4185_v7  ;;  %v883_v7 = vrot.slane %v4494_v45, 1 }
  0x42   :  { %3556 = vmatprep.subr.bf16.mxu0 %v4384_v0  ;;  %4161 = vmatprep.subr.bf16.mxu1 %v4384_v0 }
  0x45   :  { %3557 = vmatpush3.bf16.msra.mxu0 %v4186_v8  ;;  %4169 = vmatpush3.bf16.msra.mxu1 %v4186_v8  ;;  %v4224_v8 = vld [vmem:[#allocation5 + $0x108] sm:$0xff]  }
  0x46   :  { %3678 = vmatprep.subr.bf16.mxu0 %v4384_v0  ;;  %3610 = vmatprep.subr.bf16.mxu1 %v4384_v0 }
  0x48   :  { %3559 = vmatmul.mubr.bf16.vlgmr.msra.gmra.mrb[0].mxu0 %v4187_v9  ;;  %3587 = vmatmul.mubr.bf16.vlgmr.msra.gmra.mrb[0].mxu1 %v4188_v10  ;;  %v561_v9 = vshrl.u32 %v4503_v55, 16  ;;  %v565_v10 = vshll.u32 %v4515_v3, 16 }
  0x49   :  { %3679 = vmatpush3.bf16.msra.mxu0 %v4189_v11  ;;  %3562 = vmatprep.mubr.msk.bf16.mxu0 %vm4385_vm0, %v4384_v0  ;;  %v4230_v11 = vld [vmem:[#allocation5 + $0xd8] sm:$0xff]  }
  0x4a   :  { %3590 = vmatprep.mubr.msk.bf16.mxu1 %vm4385_vm0, %v4384_v0  ;;  %3611 = vmatpush3.bf16.msra.mxu1 %v4190_v12  ;;  %v4228_v12 = vld [vmem:[#allocation5 + $0x110] sm:$0xff]  }
  0x4b   :  { %3680 = vmatprep.subr.bf16.mxu0 %v4384_v0  ;;  %3612 = vmatprep.subr.bf16.mxu1 %v4384_v0 }
  0x4d   :  { %3681 = vmatpush3.bf16.msra.mxu0 %v4193_v13  ;;  %v560_v13 = vsel %vm532_vm1, %v555_v5, %v559_v6 }
  0x4e   :  { %3613 = vmatpush3.bf16.msra.mxu1 %v4194_v14  ;;  %3682 = vmatprep.subr.bf16.mxu0 %v4384_v0  ;;  %v884_v14 = vsel %vm879_vm2, %v881_v59, %v883_v7  ;;  %v4236_v59 = vld [vmem:[#allocation2 + $0x48] sm:$0xff]  }
  0x4f   :  { %3614 = vmatprep.subr.bf16.mxu1 %v4384_v0  ;;  %v605_v63 = vshll.u32 %v4236_v59, 16 }
  0x50   :  { %3563 = vmatmul.mubr.bf16.gmra.mrb[4].mxu0 %v4191_v15  ;;  %3591 = vmatmul.mubr.bf16.gmra.mrb[4].mxu1 %v4192_v16  ;;  %v4529_v15 = vld [vmem:[#allocation2 + $0x28] sm:$0xff]   ;;  %v4234_v16 = vld [vmem:[#allocation5 + $0xe0] sm:$0xff]  }
  0x51   :  { %3566 = vmatprep.mubr.msk.bf16.mxu0 %vm4385_vm0, %v4384_v0  ;;  %3594 = vmatprep.mubr.msk.bf16.mxu1 %vm4385_vm0, %v4384_v0  ;;  %v577_v33 = vshrl.u32 %v4529_v15, 16 }
  0x52   :  { %3683 = vmatpush3.bf16.msra.mxu0 %v4195_v17  ;;  %3615 = vmatpush3.bf16.msra.mxu1 %v4198_v18  ;;  %v563_v17 = vor.u32 %v561_v9, %v559_v6  ;;  %v567_v18 = vrot.slane %v565_v10, 1 }
  0x53   :  { %3684 = vmatprep.subr.bf16.mxu0 %v4384_v0  ;;  %3616 = vmatprep.subr.bf16.mxu1 %v4384_v0 }
  0x56   :  { %3685 = vmatpush3.bf16.msra.mxu0 %v4199_v19  ;;  %3617 = vmatpush3.bf16.msra.mxu1 %v4202_v20  ;;  %v885_v19 = vrot.slane %v4503_v55, 1  ;;  %v4232_v20 = vld [vmem:[#allocation5 + $0x118] sm:$0xff]   ;;  %v597_v55 = vshll.u32 %v4233_v51, 16 }
  0x57   :  { %3686 = vmatprep.subr.bf16.mxu0 %v4384_v0  ;;  %3618 = vmatprep.subr.bf16.mxu1 %v4384_v0 }
  0x58   :  { %3567 = vmatmul.mubr.bf16.gmra.mrb[8].mxu0 %v4196_v21  ;;  %3595 = vmatmul.mubr.bf16.gmra.mrb[8].mxu1 %v4197_v22  ;;  %v569_v21 = vshrl.u32 %v4515_v3, 16  ;;  %v573_v22 = vshll.u32 %v4529_v15, 16  ;;  %v599_v57 = vrot.slane %v597_v55, 1 }
  0x59   :  { %3570 = vmatprep.mubr.msk.bf16.mxu0 %vm4385_vm0, %v4384_v0  ;;  %3598 = vmatprep.mubr.msk.bf16.mxu1 %vm4385_vm0, %v4384_v0 }
  0x5a   :  { %3687 = vmatpush3.bf16.msra.mxu0 %v4203_v23  ;;  %3619 = vmatpush3.bf16.msra.mxu1 %v4204_v24  ;;  %v4238_v23 = vld [vmem:[#allocation5 + $0xe8] sm:$0xff]   ;;  %v4235_v24 = vld [vmem:[#allocation5 + $0x120] sm:$0xff]  }
  0x5b   :  { %3688 = vmatprep.subr.bf16.mxu0 %v4384_v0  ;;  %3620 = vmatprep.subr.bf16.mxu1 %v4384_v0 }
  0x5e   :  { %3689 = vmatpush3.bf16.msra.mxu0 %v4207_v25  ;;  %3621 = vmatpush3.bf16.msra.mxu1 %v4208_v26  ;;  %v568_v25 = vsel %vm532_vm1, %v563_v17, %v567_v18  ;;  %v886_v26 = vsel %vm879_vm2, %v883_v7, %v885_v19  ;;  %v609_v7 = vshrl.u32 %v4236_v59, 16 }
  0x5f   :  { %3622 = vmatprep.subr.bf16.mxu1 %v4384_v0  ;;  %3690 = vmatprep.subr.bf16.mxu0 %v4384_v0 }
  0x60   :  { %3571 = vmatmul.mubr.bf16.gmra.mrb[12].mxu0 %v4200_v27  ;;  %3599 = vmatmul.mubr.bf16.gmra.mrb[12].mxu1 %v4201_v28  ;;  %v4544_v27 = vld [vmem:[#allocation2 + $0x30] sm:$0xff]   ;;  %v4241_v28 = vld [vmem:[#allocation5 + $0xf0] sm:$0xff]  }
  0x61   :  { %3574 = vmatprep.mubr.msk.bf16.mxu0 %vm4385_vm0, %v4384_v0  ;;  %3602 = vmatprep.mubr.msk.bf16.mxu1 %vm4385_vm0, %v4384_v0  ;;  %v585_v46 = vshrl.u32 %v4544_v27, 16  ;;  %v891_v50 = vrot.slane %v4544_v27, 1 }
  0x62   :  { %3623 = vmatpush3.bf16.msra.mxu1 %v4211_v29  ;;  %3691 = vmatpush3.bf16.msra.mxu0 %v4212_v30  ;;  %v571_v29 = vor.u32 %v569_v21, %v567_v18  ;;  %v575_v30 = vrot.slane %v573_v22, 1 }
  0x63   :  { %3624 = vmatprep.subr.bf16.mxu1 %v4384_v0  ;;  %3692 = vmatprep.subr.bf16.mxu0 %v4384_v0 }
  0x64   :  { %v576_v38 = vsel %vm532_vm1, %v571_v29, %v575_v30 }
  0x66   :  { %3625 = vmatpush3.bf16.msra.mxu1 %v4213_v31  ;;  %3693 = vmatpush3.bf16.msra.mxu0 %v4217_v34  ;;  %v887_v31 = vrot.slane %v4515_v3, 1  ;;  %v581_v34 = vshll.u32 %v4544_v27, 16  ;;  %v895_v3 = vrot.slane %v4233_v51, 1 }
  0x67   :  { %3746 = vmatprep.subr.bf16.mxu1 %v4384_v0  ;;  %3814 = vmatprep.subr.bf16.mxu0 %v4384_v0 }
  0x68   :  { %3575 = vmatmul.mubr.bf16.gmra.mrb[16].mxu0 %v4205_v35  ;;  %3603 = vmatmul.mubr.bf16.gmra.mrb[16].mxu1 %v4206_v36  ;;  %v889_v35 = vrot.slane %v4529_v15, 1  ;;  %v4244_v36 = vld [vmem:[#allocation5 + $0xf8] sm:$0xff]   ;;  %v888_v39 = vsel %vm879_vm2, %v885_v19, %v887_v31  ;;  %v583_v42 = vrot.slane %v581_v34, 1 }
  0x69   :  { %3578 = vmatprep.mubr.msk.bf16.mxu0 %vm4385_vm0, %v4384_v0  ;;  %3606 = vmatprep.mubr.msk.bf16.mxu1 %vm4385_vm0, %v4384_v0 }
  0x6a   :  { %v890_v45 = vsel %vm879_vm2, %v887_v31, %v889_v35  ;;  %v587_v48 = vor.u32 %v585_v46, %v583_v42  ;;  %v892_v53 = vsel %vm879_vm2, %v889_v35, %v891_v50 }
  0x70   :  { %3579 = vmatmul.mubr.bf16.gmra.mrb[20].mxu0 %v4209_v40  ;;  %3607 = vmatmul.mubr.bf16.gmra.mrb[20].mxu1 %v4210_v41  ;;  %v4231_v40 = vld [vmem:[#allocation2 + $0x38] sm:$0xff]   ;;  %v579_v41 = vor.u32 %v577_v33, %v575_v30  ;;  %v4612_v33 = vld [vmem:[#allocation2 + $0x8] sm:$0xf] }
  0x71   :  { %3582 = vmatprep.mubr.msk.bf16.mxu0 %vm4385_vm0, %v4384_v0  ;;  %3626 = vmatprep.mubr.msk.bf16.mxu1 %vm4385_vm0, %v4384_v0  ;;  %v589_v47 = vshll.u32 %v4231_v40, 16  ;;  %v893_v58 = vrot.slane %v4231_v40, 1 }
  0x72   :  { %v584_v44 = vsel %vm532_vm1, %v579_v41, %v583_v42 }
  0x73   :  { %v896_v6 = vsel %vm879_vm2, %v893_v58, %v895_v3 }
  0x78   :  { %3583 = vmatmul.mubr.bf16.gmra.mrb[24].mxu0 %v4214_v49  ;;  %3627 = vmatmul.mubr.bf16.vlgmr.msra.gmra.mrb[24].mxu1 %v544_v52  ;;  %v591_v49 = vrot.slane %v589_v47, 1 }
  0x79   :  { %3630 = vmatprep.mubr.msk.bf16.mxu1 %vm4385_vm0, %v4384_v0  ;;  %3694 = vmatprep.mubr.msk.bf16.mxu0 %vm4385_vm0, %v4384_v0 }
  0x7a   :  { %3747 = vmatpush3.bf16.msra.mxu1 %v4218_v54  ;;  %v592_v52 = vsel %vm532_vm1, %v587_v48, %v591_v49  ;;  %v593_v54 = vshrl.u32 %v4231_v40, 16 }
  0x7b   :  { %3748 = vmatprep.subr.bf16.mxu1 %v4384_v0 }
  0x7c   :  { %v595_v56 = vor.u32 %v593_v54, %v591_v49 }
  0x7e   :  { %3749 = vmatpush3.bf16.msra.mxu1 %v4223_v60  ;;  %v600_v60 = vsel %vm532_vm1, %v595_v56, %v599_v57  ;;  %v4252_v56 = vld [vmem:[#allocation5 + $0x148] sm:$0xff]  }
  0x7f   :  { %3750 = vmatprep.subr.bf16.mxu1 %v4384_v0 }
  0x80   :  { %3631 = vmatmul.mubr.bf16.gmra.mrb[28].mxu1 %v552_v1  ;;  %3695 = vmatmul.mubr.bf16.vlgmr.msra.gmra.mrb[28].mxu0 %v882_v2  ;;  %v603_v1 = vor.u32 %v601_v62, %v599_v57  ;;  %v607_v2 = vrot.slane %v605_v63, 1  ;;  %v4256_v63 = vld [vmem:[#allocation5 + $0x150] sm:$0xff]  }
  0x81   :  { %3815 = vmatpush3.bf16.msra.mxu0 %v4221_v61  ;;  %3634 = vmatprep.mubr.msk.bf16.mxu1 %vm4385_vm0, %v4384_v0  ;;  %v894_v61 = vsel %vm879_vm2, %v891_v50, %v893_v58  ;;  %v4248_v50 = vld [vmem:[#allocation5 + $0x140] sm:$0xff]  }
  0x82   :  { %3698 = vmatprep.mubr.msk.bf16.mxu0 %vm4385_vm0, %v4384_v0  ;;  %3816 = vmatprep.subr.bf16.mxu0 %v4384_v0  ;;  %v608_v5 = vsel %vm532_vm1, %v603_v1, %v607_v2  ;;  %v611_v9 = vor.u32 %v609_v7, %v607_v2 }
  0x83   :  { %3751 = vmatpush3.bf16.msra.mxu1 %v4227_v4  ;;  %v4237_v4 = vld [vmem:[#allocation2 + $0x50] sm:$0xff]  }
  0x84   :  { %3752 = vmatprep.subr.bf16.mxu1 %v4384_v0  ;;  %v617_v15 = vshrl.u32 %v4237_v4, 16  ;;  %v899_v19 = vrot.slane %v4237_v4, 1 }
  0x85   :  { %3817 = vmatpush3.bf16.msra.mxu0 %v4224_v8  ;;  %v613_v8 = vshll.u32 %v4237_v4, 16 }
  0x86   :  { %3818 = vmatprep.subr.bf16.mxu0 %v4384_v0 }
  0x87   :  { %3753 = vmatpush3.bf16.msra.mxu1 %v4230_v11  ;;  %v615_v10 = vrot.slane %v613_v8, 1  ;;  %v897_v11 = vrot.slane %v4236_v59, 1  ;;  %v4250_v59 = vld [vmem:[#allocation5 + $0x180] sm:$0xff]  }
  0x88   :  { %3635 = vmatmul.mubr.bf16.gmra.mrb[32].mxu1 %v560_v13  ;;  %3699 = vmatmul.mubr.bf16.gmra.mrb[32].mxu0 %v884_v14 }
  0x89   :  { %3638 = vmatprep.mubr.msk.bf16.mxu1 %vm4385_vm0, %v4384_v0  ;;  %3702 = vmatprep.mubr.msk.bf16.mxu0 %vm4385_vm0, %v4384_v0  ;;  %v616_v13 = vsel %vm532_vm1, %v611_v9, %v615_v10  ;;  %v898_v14 = vsel %vm879_vm2, %v895_v3, %v897_v11  ;;  %v619_v17 = vor.u32 %v617_v15, %v615_v10  ;;  %v4253_v3 = vld [vmem:[#allocation5 + $0x188] sm:$0xff]   ;;  %v4652_v9 = vld [vmem:[#allocation2 + $0x24] sm:$0xff]  }
  0x8a   :  { %3819 = vmatpush3.bf16.msra.mxu0 %v4228_v12  ;;  %3754 = vmatprep.subr.bf16.mxu1 %v4384_v0  ;;  %v4240_v12 = vld [vmem:[#allocation2 + $0x58] sm:$0xff]   ;;  %v900_v22 = vsel %vm879_vm2, %v897_v11, %v899_v19 }
  0x8b   :  { %3820 = vmatprep.subr.bf16.mxu0 %v4384_v0  ;;  %3755 = vmatpush3.bf16.msra.mxu1 %v4234_v16  ;;  %v621_v16 = vshll.u32 %v4240_v12, 16  ;;  %v901_v27 = vrot.slane %v4240_v12, 1 }
  0x8c   :  { %3756 = vmatprep.subr.bf16.mxu1 %v4384_v0 }
  0x8d   :  { %v623_v18 = vrot.slane %v621_v16, 1  ;;  %v902_v29 = vsel %vm879_vm2, %v899_v19, %v901_v27  ;;  %v1540_v16 = vshrl.u32 %v4652_v9, 16  ;;  %v4267_v19 = vld [vmem:[#allocation5 + $0x168] sm:$0xff]  }
  0x8e   :  { %3821 = vmatpush3.bf16.msra.mxu0 %v4232_v20  ;;  %v4243_v20 = vld [vmem:[#allocation2 + $0x60] sm:$0x1f]  }
  0x8f   :  { %3822 = vmatprep.subr.bf16.mxu0 %v4384_v0  ;;  %3757 = vmatpush3.bf16.msra.mxu1 %v4238_v23  ;;  %v624_v21 = vsel %vm532_vm1, %v619_v17, %v623_v18  ;;  %v625_v23 = vshrl.u32 %v4240_v12, 16  ;;  %v633_v30 = vshrl.u32 %v4243_v20, 16  ;;  %v903_v31 = vrot.slane %v4243_v20, 1  ;;  %v4257_v12 = vld [vmem:[#allocation5 + $0x190] sm:$0xff]  }
  0x90   :  { %3639 = vmatmul.mubr.bf16.gmra.mrb[36].mxu1 %v568_v25  ;;  %3703 = vmatmul.mubr.bf16.gmra.mrb[36].mxu0 %v886_v26  ;;  %v1543_v17 = vshll.u32 %v4652_v9, 16 }
  0x91   :  { %3642 = vmatprep.mubr.msk.bf16.mxu1 %vm4385_vm0, %v4384_v0  ;;  %3706 = vmatprep.mubr.msk.bf16.mxu0 %vm4385_vm0, %v4384_v0  ;;  %v627_v25 = vor.u32 %v625_v23, %v623_v18  ;;  %v4261_v18 = vld [vmem:[#allocation5 + $0x198] sm:$0xff]   ;;  %v1542_v23 = vrot.slane %v1540_v16, 1 }
  0x92   :  { %3823 = vmatpush3.bf16.msra.mxu0 %v4235_v24  ;;  %3758 = vmatprep.subr.bf16.mxu1 %v4384_v0  ;;  %v629_v24 = vshll.u32 %v4243_v20, 16 }
  0x93   :  { %3824 = vmatprep.subr.bf16.mxu0 %v4384_v0  ;;  %3759 = vmatpush3.bf16.msra.mxu1 %v4241_v28 }
  0x94   :  { %3760 = vmatprep.subr.bf16.mxu1 %v4384_v0  ;;  %v631_v26 = vrot.slane %v629_v24, 1  ;;  %v1545_v24 = vrot.slane %v1543_v17, 2 }
  0x96   :  { %3825 = vmatpush3.bf16.msra.mxu0 %v4239_v32  ;;  %v632_v28 = vsel %vm532_vm1, %v627_v25, %v631_v26  ;;  %v1127_v32 = vld [vmem:[#allocation2 + $0x4] sm:$0xe]  ;;  %v635_v34 = vor.u32 %v633_v30, %v631_v26  ;;  %v4264_v25 = vld [vmem:[#allocation5 + $0x1a0] sm:$0xff]  }
  0x97   :  { %3826 = vmatprep.subr.bf16.mxu0 %v4384_v0  ;;  %3761 = vmatpush3.bf16.msra.mxu1 %v4244_v36  ;;  %v3274_v35 = vcombine.low %v1127_v32, %v4612_v33  ;;  %v4615_v36 = vld [vmem:[#allocation2 + $0xc] sm:$0xff]   ;;  %v4270_v26 = vld [vmem:[#allocation5 + $0x170] sm:$0xff]  }
  0x98   :  { %3643 = vmatmul.mubr.bf16.gmra.mrb[40].mxu1 %v576_v38  ;;  %3707 = vmatmul.mubr.bf16.gmra.mrb[40].mxu0 %v888_v39  ;;  %v1236_v39 = vrot.slane %v4615_v36, 1  ;;  %v1513_v42 = vshrl.u32 %v4615_v36, 16  ;;  %v4274_v32 = vld [vmem:[#allocation5 + $0x178] sm:$0xff]  }
  0x99   :  { %3646 = vmatprep.mubr.msk.bf16.mxu1 %vm4385_vm0, %v4384_v0  ;;  %3710 = vmatprep.mubr.msk.bf16.mxu0 %vm4385_vm0, %v4384_v0  ;;  %v1235_v38 = vrot.slane %v3274_v35, 1  ;;  %v1505_v40 = vshrl.u32 %v3274_v35, 16  ;;  %v1508_v41 = vshll.u32 %v3274_v35, 16 }
  0x9a   :  { %3827 = vmatpush3.bf16.msra.mxu0 %v4242_v37  ;;  %3882 = vmatprep.subr.bf16.mxu1 %v4384_v0  ;;  %v904_v37 = vsel %vm879_vm2, %v901_v27, %v903_v31  ;;  %v1515_v48 = vrot.slane %v1513_v42, 1 }
  0x9b   :  { %3828 = vmatprep.subr.bf16.mxu0 %v4384_v0  ;;  %v1507_v46 = vrot.slane %v1505_v40, 1  ;;  %v1510_v47 = vrot.slane %v1508_v41, 2  ;;  %v4271_v40 = vld [vmem:[#allocation5 + $0x1b0] sm:$0xff]  }
  0x9e   :  { %3829 = vmatpush3.bf16.msra.mxu0 %v4245_v43  ;;  %v1516_v43 = vshll.u32 %v4615_v36, 16 }
  0x9f   :  { %3950 = vmatprep.subr.bf16.mxu0 %v4384_v0 }
  0xa0   :  { %3647 = vmatmul.mubr.bf16.gmra.mrb[44].mxu1 %v584_v44  ;;  %3711 = vmatmul.mubr.bf16.gmra.mrb[44].mxu0 %v890_v45  ;;  %v1237_v44 = vsel %vm879_vm2, %v1235_v38, %v1236_v39  ;;  %v4626_v45 = vld [vmem:[#allocation2 + $0x14] sm:$0xff]   ;;  %v1518_v49 = vrot.slane %v1516_v43, 2 }
  0xa1   :  { %3650 = vmatprep.mubr.msk.bf16.mxu1 %vm4385_vm0, %v4384_v0  ;;  %3714 = vmatprep.mubr.msk.bf16.mxu0 %vm4385_vm0, %v4384_v0  ;;  %v1238_v51 = vrot.slane %v4626_v45, 1  ;;  %v1522_v54 = vshrl.u32 %v4626_v45, 16  ;;  %v1525_v55 = vshll.u32 %v4626_v45, 16 }
  0xa3   :  { %v1239_v57 = vsel %vm879_vm2, %v1236_v39, %v1238_v51  ;;  %v1527_v62 = vrot.slane %v1525_v55, 2 }
  0xa8   :  { %3651 = vmatmul.mubr.bf16.gmra.mrb[48].mxu1 %v592_v52  ;;  %3715 = vmatmul.mubr.bf16.gmra.mrb[48].mxu0 %v892_v53  ;;  %v1511_v52 = vor.u32 %v1510_v47, %v1507_v46  ;;  %v1519_v53 = vor.u32 %v1518_v49, %v1515_v48  ;;  %v4275_v46 = vld [vmem:[#allocation5 + $0x1b8] sm:$0xff]   ;;  %v4696_v49 = vld [vmem:[#allocation2 + $0x3c] sm:$0xff]  }
  0xa9   :  { %3654 = vmatprep.mubr.msk.bf16.mxu1 %vm4385_vm0, %v4384_v0  ;;  %3718 = vmatprep.mubr.msk.bf16.mxu0 %vm4385_vm0, %v4384_v0  ;;  %v1570_v55 = vshll.u32 %v4696_v49, 16 }
  0xaa   :  { %v1520_v58 = vsel %vm1503_vm3, %v1511_v52, %v1519_v53  ;;  %v1248_v52 = vrot.slane %v4696_v49, 1 }
  0xb0   :  { %3655 = vmatmul.mubr.bf16.gmra.mrb[52].mxu1 %v600_v60  ;;  %3719 = vmatmul.mubr.bf16.gmra.mrb[52].mxu0 %v894_v61  ;;  %v4638_v60 = vld [vmem:[#allocation2 + $0x1c] sm:$0xff]   ;;  %v1524_v61 = vrot.slane %v1522_v54, 1  ;;  %v1567_v54 = vshrl.u32 %v4696_v49, 16 }
  0xb1   :  { %3658 = vmatprep.mubr.msk.bf16.mxu1 %vm4385_vm0, %v4384_v0  ;;  %3722 = vmatprep.mubr.msk.bf16.mxu0 %vm4385_vm0, %v4384_v0  ;;  %v1240_v1 = vrot.slane %v4638_v60, 1  ;;  %v1531_v4 = vshrl.u32 %v4638_v60, 16 }
  0xb2   :  { %v1528_v2 = vor.u32 %v1527_v62, %v1524_v61  ;;  %v1572_v61 = vrot.slane %v1570_v55, 2  ;;  %v1482_v55 = vld [vmem:[#allocation2 + $0x68] sm:$0x3] }
  0xb3   :  { %v1241_v7 = vsel %vm879_vm2, %v1238_v51, %v1240_v1  ;;  %v1533_v10 = vrot.slane %v1531_v4, 1 }
  0xb4   :  { %v1529_v8 = vsel %vm1503_vm3, %v1519_v53, %v1528_v2 }
  0xb8   :  { %3659 = vmatmul.mubr.bf16.gmra.mrb[56].mxu1 %v608_v5  ;;  %3723 = vmatmul.mubr.bf16.gmra.mrb[56].mxu0 %v896_v6  ;;  %v1534_v5 = vshll.u32 %v4638_v60, 16  ;;  %v4259_v6 = vld [vmem:[#allocation5 + $0x158] sm:$0xff]  }
  0xb9   :  { %3662 = vmatprep.mubr.msk.bf16.mxu1 %vm4385_vm0, %v4384_v0  ;;  %3726 = vmatprep.mubr.msk.bf16.mxu0 %vm4385_vm0, %v4384_v0 }
  0xba   :  { %v1536_v11 = vrot.slane %v1534_v5, 2  ;;  %v4719_v5 = vld [vmem:[#allocation2 + $0x4c] sm:$0xff]  }
  0xbc   :  { %v1537_v15 = vor.u32 %v1536_v11, %v1533_v10  ;;  %v1585_v11 = vshrl.u32 %v4719_v5, 16 }
  0xc0   :  { %3663 = vmatmul.mubr.bf16.gmra.mrb[60].mxu1 %v616_v13  ;;  %3727 = vmatmul.mubr.bf16.gmra.mrb[60].mxu0 %v898_v14  ;;  %v4263_v13 = vld [vmem:[#allocation5 + $0x160] sm:$0xff]   ;;  %v1242_v14 = vrot.slane %v4652_v9, 1 }
  0xc1   :  { %3666 = vmatprep.mubr.msk.bf16.mxu1 %vm4385_vm0, %v4384_v0  ;;  %3730 = vmatprep.mubr.msk.bf16.mxu0 %vm4385_vm0, %v4384_v0 }
  0xc2   :  { %v1243_v20 = vsel %vm879_vm2, %v1240_v1, %v1242_v14 }
  0xc8   :  { %3667 = vmatmul.mubr.bf16.gmra.mrb[64].mxu1 %v624_v21  ;;  %3731 = vmatmul.mubr.bf16.gmra.mrb[64].mxu0 %v900_v22  ;;  %v1538_v21 = vsel %vm1503_vm3, %v1528_v2, %v1537_v15  ;;  %v4667_v22 = vld [vmem:[#allocation2 + $0x2c] sm:$0xff]  }
  0xc9   :  { %3670 = vmatprep.mubr.msk.bf16.mxu1 %vm4385_vm0, %v4384_v0  ;;  %3734 = vmatprep.mubr.msk.bf16.mxu0 %vm4385_vm0, %v4384_v0  ;;  %v1244_v27 = vrot.slane %v4667_v22, 1  ;;  %v1552_v30 = vshll.u32 %v4667_v22, 16 }
  0xcb   :  { %v1554_v39 = vrot.slane %v1552_v30, 2 }
  0xd0   :  { %3671 = vmatmul.mubr.bf16.gmra.mrb[68].mxu1 %v632_v28  ;;  %3735 = vmatmul.mubr.bf16.gmra.mrb[68].mxu0 %v902_v29  ;;  %v1546_v28 = vor.u32 %v1545_v24, %v1542_v23  ;;  %v1549_v29 = vshrl.u32 %v4667_v22, 16  ;;  %v1587_v23 = vrot.slane %v1585_v11, 1 }
  0xd1   :  { %3674 = vmatprep.mubr.msk.bf16.mxu1 %vm4385_vm0, %v4384_v0  ;;  %3738 = vmatprep.mubr.msk.bf16.mxu0 %vm4385_vm0, %v4384_v0 }
  0xd2   :  { %v1547_v35 = vsel %vm1503_vm3, %v1537_v15, %v1546_v28  ;;  %v1551_v38 = vrot.slane %v1549_v29, 1 }
  0xd4   :  { %v1555_v42 = vor.u32 %v1554_v39, %v1551_v38  ;;  %v4751_v38 = vld [vmem:[#allocation2 + $0x5c] sm:$0xff]  }
  0xd6   :  { %v1556_v48 = vsel %vm1503_vm3, %v1546_v28, %v1555_v42 }
  0xd8   :  { %3675 = vmatmul.mubr.bf16.gmra.mrb[72].mxu1 %v635_v34  ;;  %3739 = vmatmul.mubr.bf16.gmra.mrb[72].mxu0 %v904_v37  ;;  %v1245_v34 = vsel %vm879_vm2, %v1242_v14, %v1244_v27  ;;  %v4682_v37 = vld [vmem:[#allocation2 + $0x34] sm:$0xff]  }
  0xd9   :  { %3742 = vmatprep.mubr.msk.bf16.mxu0 %vm4385_vm0, %v4384_v0  ;;  %3762 = vmatprep.mubr.msk.bf16.mxu1 %vm4385_vm0, %v4384_v0  ;;  %v1246_v41 = vrot.slane %v4682_v37, 1  ;;  %v1558_v43 = vshrl.u32 %v4682_v37, 16 }
  0xdb   :  { %v1247_v47 = vsel %vm879_vm2, %v1244_v27, %v1246_v41 }
  0xe0   :  { %3743 = vmatmul.mubr.bf16.gmra.mrb[76].mxu0 %v903_v31  ;;  %3763 = vmatmul.mubr.bf16.vlgmr.msra.gmra.mrb[76].mxu1 %v1237_v44  ;;  %v4268_v31 = vld [vmem:[#allocation5 + $0x1a8] sm:$0xff]   ;;  %v1561_v44 = vshll.u32 %v4682_v37, 16 }
  0xe1   :  { %3766 = vmatprep.mubr.msk.bf16.mxu1 %vm4385_vm0, %v4384_v0  ;;  %3830 = vmatprep.mubr.msk.bf16.mxu0 %vm4385_vm0, %v4384_v0 }
  0xe2   :  { %3883 = vmatpush3.bf16.msra.mxu1 %v4248_v50  ;;  %v1560_v50 = vrot.slane %v1558_v43, 1  ;;  %v1563_v51 = vrot.slane %v1561_v44, 2 }
  0xe3   :  { %3884 = vmatprep.subr.bf16.mxu1 %v4384_v0 }
  0xe4   :  { %v1564_v53 = vor.u32 %v1563_v51, %v1560_v50  ;;  %v1603_v51 = vshrl.u32 %v4751_v38, 16 }
  0xe6   :  { %3885 = vmatpush3.bf16.msra.mxu1 %v4252_v56  ;;  %v1249_v56 = vsel %vm879_vm2, %v1246_v41, %v1248_v52 }
  0xe7   :  { %3886 = vmatprep.subr.bf16.mxu1 %v4384_v0 }
  0xe8   :  { %3767 = vmatmul.mubr.bf16.gmra.mrb[80].mxu1 %v1239_v57  ;;  %3831 = vmatmul.mubr.bf16.vlgmr.msra.gmra.mrb[80].mxu0 %v1520_v58  ;;  %v1565_v57 = vsel %vm1503_vm3, %v1555_v42, %v1564_v53  ;;  %v4708_v58 = vld [vmem:[#allocation2 + $0x44] sm:$0xff]  }
  0xe9   :  { %3951 = vmatpush3.bf16.msra.mxu0 %v4250_v59  ;;  %3770 = vmatprep.mubr.msk.bf16.mxu1 %vm4385_vm0, %v4384_v0  ;;  %v1569_v59 = vrot.slane %v1567_v54, 1  ;;  %v1250_v62 = vrot.slane %v4708_v58, 1  ;;  %v1576_v1 = vshrl.u32 %v4708_v58, 16  ;;  %v1579_v2 = vshll.u32 %v4708_v58, 16  ;;  %v1152_v54 = vld [vmem:[#allocation2 + $0x68] sm:$0x1] }
  0xea   :  { %3834 = vmatprep.mubr.msk.bf16.mxu0 %vm4385_vm0, %v4384_v0  ;;  %3952 = vmatprep.subr.bf16.mxu0 %v4384_v0 }
  0xeb   :  { %3887 = vmatpush3.bf16.msra.mxu1 %v4256_v63  ;;  %v1573_v63 = vor.u32 %v1572_v61, %v1569_v59 }
  0xec   :  { %3888 = vmatprep.subr.bf16.mxu1 %v4384_v0 }
  0xed   :  { %3953 = vmatpush3.bf16.msra.mxu0 %v4253_v3  ;;  %v1251_v3 = vsel %vm879_vm2, %v1248_v52, %v1250_v62  ;;  %v1574_v4 = vsel %vm1503_vm3, %v1564_v53, %v1573_v63  ;;  %v1606_v52 = vshll.u32 %v4751_v38, 16  ;;  %v1151_v53 = vld [vmem:[#allocation2 + $0x64] sm:$0xf] }
  0xee   :  { %3954 = vmatprep.subr.bf16.mxu0 %v4384_v0 }
  0xef   :  { %3889 = vmatpush3.bf16.msra.mxu1 %v4259_v6  ;;  %v1578_v6 = vrot.slane %v1576_v1, 1 }
  0xf0   :  { %3771 = vmatmul.mubr.bf16.gmra.mrb[84].mxu1 %v1241_v7  ;;  %3835 = vmatmul.mubr.bf16.gmra.mrb[84].mxu0 %v1529_v8  ;;  %v1581_v7 = vrot.slane %v1579_v2, 2  ;;  %v1252_v8 = vrot.slane %v4719_v5, 1 }
  0xf1   :  { %3774 = vmatprep.mubr.msk.bf16.mxu1 %vm4385_vm0, %v4384_v0  ;;  %3838 = vmatprep.mubr.msk.bf16.mxu0 %vm4385_vm0, %v4384_v0 }
  0xf2   :  { %3955 = vmatpush3.bf16.msra.mxu0 %v4257_v12  ;;  %3890 = vmatprep.subr.bf16.mxu1 %v4384_v0  ;;  %v1582_v10 = vor.u32 %v1581_v7, %v1578_v6  ;;  %v1588_v12 = vshll.u32 %v4719_v5, 16  ;;  %v1605_v6 = vrot.slane %v1603_v51, 1  ;;  %v1608_v7 = vrot.slane %v1606_v52, 2 }
  0xf3   :  { %3956 = vmatprep.subr.bf16.mxu0 %v4384_v0  ;;  %3891 = vmatpush3.bf16.msra.mxu1 %v4263_v13 }
  0xf4   :  { %3892 = vmatprep.subr.bf16.mxu1 %v4384_v0  ;;  %v1590_v24 = vrot.slane %v1588_v12, 2  ;;  %v1609_v12 = vor.u32 %v1608_v7, %v1605_v6 }
  0xf6   :  { %3957 = vmatpush3.bf16.msra.mxu0 %v4261_v18  ;;  %v1253_v18 = vsel %vm879_vm2, %v1250_v62, %v1252_v8  ;;  %v1591_v30 = vor.u32 %v1590_v24, %v1587_v23 }
  0xf7   :  { %3958 = vmatprep.subr.bf16.mxu0 %v4384_v0  ;;  %3893 = vmatpush3.bf16.msra.mxu1 %v4267_v19  ;;  %v1583_v19 = vsel %vm1503_vm3, %v1573_v63, %v1582_v10 }
  0xf8   :  { %3775 = vmatmul.mubr.bf16.gmra.mrb[88].mxu1 %v1243_v20  ;;  %3839 = vmatmul.mubr.bf16.gmra.mrb[88].mxu0 %v1538_v21  ;;  %v4738_v21 = vld [vmem:[#allocation2 + $0x54] sm:$0xff]   ;;  %v1592_v43 = vsel %vm1503_vm3, %v1582_v10, %v1591_v30 }
  0xf9   :  { %3778 = vmatprep.mubr.msk.bf16.mxu1 %vm4385_vm0, %v4384_v0  ;;  %3842 = vmatprep.mubr.msk.bf16.mxu0 %vm4385_vm0, %v4384_v0  ;;  %v1594_v27 = vshrl.u32 %v4738_v21, 16  ;;  %v1597_v28 = vshll.u32 %v4738_v21, 16  ;;  %v1254_v29 = vrot.slane %v4738_v21, 1 }
  0xfa   :  { %3959 = vmatpush3.bf16.msra.mxu0 %v4264_v25  ;;  %3894 = vmatprep.subr.bf16.mxu1 %v4384_v0 }
  0xfb   :  { %3960 = vmatprep.subr.bf16.mxu0 %v4384_v0  ;;  %3895 = vmatpush3.bf16.msra.mxu1 %v4270_v26  ;;  %v1596_v39 = vrot.slane %v1594_v27, 1  ;;  %v1255_v42 = vsel %vm879_vm2, %v1252_v8, %v1254_v29 }
  0xfc   :  { %3896 = vmatprep.subr.bf16.mxu1 %v4384_v0 }
  0xfe   :  { %3961 = vmatpush3.bf16.msra.mxu0 %v4268_v31 }
  0xff   :  { %3962 = vmatprep.subr.bf16.mxu0 %v4384_v0  ;;  %3897 = vmatpush3.bf16.msra.mxu1 %v4274_v32 }
 0x100   :  { %3779 = vmatmul.mubr.bf16.gmra.mrb[92].mxu1 %v1245_v34  ;;  %3843 = vmatmul.mubr.bf16.gmra.mrb[92].mxu0 %v1547_v35 }
 0x101   :  { %3782 = vmatprep.mubr.msk.bf16.mxu1 %vm4385_vm0, %v4384_v0  ;;  %3846 = vmatprep.mubr.msk.bf16.mxu0 %vm4385_vm0, %v4384_v0 }
 0x102   :  { %3963 = vmatpush3.bf16.msra.mxu0 %v4271_v40  ;;  %4018 = vmatprep.subr.bf16.mxu1 %v4384_v0  ;;  %v1599_v40 = vrot.slane %v1597_v28, 2 }
 0x103   :  { %3964 = vmatprep.subr.bf16.mxu0 %v4384_v0 }
 0x104   :  { %v1600_v50 = vor.u32 %v1599_v40, %v1596_v39  ;;  %v1842_v40 = vld [vmem:[#allocation2 + $0x4] sm:$0xc] }
 0x105   :  { %v3304_v52 = vcombine.low %v1842_v40, %v4612_v33 }
 0x106   :  { %3965 = vmatpush3.bf16.msra.mxu0 %v4275_v46  ;;  %v1601_v63 = vsel %vm1503_vm3, %v1591_v30, %v1600_v50  ;;  %v1610_v27 = vsel %vm1503_vm3, %v1600_v50, %v1609_v12 }
 0x107   :  { %4086 = vmatprep.subr.bf16.mxu0 %v4384_v0 }
 0x108   :  { %3783 = vmatmul.mubr.bf16.gmra.mrb[96].mxu1 %v1247_v47  ;;  %3847 = vmatmul.mubr.bf16.gmra.mrb[96].mxu0 %v1556_v48  ;;  %v1256_v48 = vrot.slane %v4751_v38, 1 }
 0x109   :  { %3786 = vmatprep.mubr.msk.bf16.mxu1 %vm4385_vm0, %v4384_v0  ;;  %3850 = vmatprep.mubr.msk.bf16.mxu0 %vm4385_vm0, %v4384_v0 }
 0x10a   :  { %v1257_v62 = vsel %vm879_vm2, %v1254_v29, %v1256_v48 }
 0x110   :  { %3787 = vmatmul.mubr.bf16.gmra.mrb[100].mxu1 %v1249_v56  ;;  %3851 = vmatmul.mubr.bf16.gmra.mrb[100].mxu0 %v1565_v57 }
 0x111   :  { %3790 = vmatprep.mubr.msk.bf16.mxu1 %vm4385_vm0, %v4384_v0  ;;  %3854 = vmatprep.mubr.msk.bf16.mxu0 %vm4385_vm0, %v4384_v0 }
 0x118   :  { %3791 = vmatmul.mubr.bf16.gmra.mrb[104].mxu1 %v1251_v3  ;;  %3855 = vmatmul.mubr.bf16.gmra.mrb[104].mxu0 %v1574_v4  ;;  %v3286_v3 = vcombine.low %v1151_v53, %v1152_v54  ;;  %v4776_v4 = vcombine.low %v1151_v53, %v1482_v55  ;;  %v1864_v55 = vrot.slane %v3304_v52, 2  ;;  %v4842_v52 = vld [vmem:[#allocation2 + $0x18] sm:$0xff]  }
 0x119   :  { %3794 = vmatprep.mubr.msk.bf16.mxu1 %vm4385_vm0, %v4384_v0  ;;  %3858 = vmatprep.mubr.msk.bf16.mxu0 %vm4385_vm0, %v4384_v0 }
 0x11a   :  { %v1258_v11 = vrot.slane %v3286_v3, 1 }
 0x11b   :  { %v4728_v13 = vpop.f32.mrb[0].mxu0  ;;  %v4730_v14 = vpop.f32.mrb[0].mxu1 }
 0x11c   :  { %v3560_v15 = vpop.f32.mrb[1].mxu0  ;;  %v3588_v16 = vpop.f32.mrb[1].mxu1 }
 0x11d   :  { %v4732_v17 = vpop.f32.mrb[2].mxu0  ;;  %v4736_v20 = vpop.f32.mrb[2].mxu1  ;;  %v1612_v15 = vshrl.u32 %v4776_v4, 16  ;;  %v1615_v16 = vshll.u32 %v4776_v4, 16 }
 0x11e   :  { %v3561_v25 = vpop.f32.mrb[3].mxu0  ;;  %v3589_v26 = vpop.f32.mrb[3].mxu1 }
 0x11f   :  { %v1259_v26 = vsel %vm879_vm2, %v1256_v48, %v1258_v11  ;;  %v1614_v29 = vrot.slane %v1612_v15, 1  ;;  %v1617_v30 = vrot.slane %v1615_v16, 2  ;;  %v4277_v16 = vld [vmem:[#allocation5 + $0x1c0] sm:$0xff]  }
 0x120   :  { %3795 = vmatmul.mubr.bf16.gmra.mrb[108].mxu1 %v1253_v18  ;;  %3859 = vmatmul.mubr.bf16.gmra.mrb[108].mxu0 %v1583_v19 }
 0x121   :  { %3798 = vmatprep.mubr.msk.bf16.mxu1 %vm4385_vm0, %v4384_v0  ;;  %3862 = vmatprep.mubr.msk.bf16.mxu0 %vm4385_vm0, %v4384_v0  ;;  %v1618_v39 = vor.u32 %v1617_v30, %v1614_v29 }
 0x123   :  { %v4747_v31 = vpop.f32.mrb[4].mxu0  ;;  %v4749_v32 = vpop.f32.mrb[4].mxu1  ;;  %v1619_v50 = vsel %vm1503_vm3, %v1609_v12, %v1618_v39  ;;  %v4825_v12 = vld [vmem:[#allocation2 + $0x10] sm:$0xff]  }
 0x124   :  { %v3564_v34 = vpop.f32.mrb[5].mxu0  ;;  %v3592_v35 = vpop.f32.mrb[5].mxu1 }
 0x125   :  { %v4753_v41 = vpop.f32.mrb[6].mxu0  ;;  %v4757_v44 = vpop.f32.mrb[6].mxu1 }
 0x126   :  { %v3565_v46 = vpop.f32.mrb[7].mxu0  ;;  %v3593_v47 = vpop.f32.mrb[7].mxu1 }
 0x128   :  { %3799 = vmatmul.mubr.bf16.gmra.mrb[112].mxu1 %v1255_v42  ;;  %3863 = vmatmul.mubr.bf16.gmra.mrb[112].mxu0 %v1592_v43 }
 0x129   :  { %3802 = vmatprep.mubr.msk.bf16.mxu1 %vm4385_vm0, %v4384_v0  ;;  %3866 = vmatprep.mubr.msk.bf16.mxu0 %vm4385_vm0, %v4384_v0 }
 0x12b   :  { %v4766_v56 = vpop.f32.mrb[8].mxu0  ;;  %v4768_v57 = vpop.f32.mrb[8].mxu1 }
 0x12c   :  { %v3568_v59 = vpop.f32.mrb[9].mxu0  ;;  %v3596_v61 = vpop.f32.mrb[9].mxu1 }
 0x12d   :  { %v4772_v1 = vpop.f32.mrb[10].mxu0  ;;  %v4774_v2 = vpop.f32.mrb[10].mxu1  ;;  %v1865_v59 = vrot.slane %v4615_v36, 2  ;;  %v2111_v61 = vld [vmem:[#allocation2 + $0x8] sm:$0xc] }
 0x12e   :  { %v3569_v8 = vpop.f32.mrb[11].mxu0  ;;  %v3597_v10 = vpop.f32.mrb[11].mxu1 }
 0x12f   :  { %v1866_v8 = vsel %vm1863_vm4, %v1864_v55, %v1865_v59 }
 0x130   :  { %3803 = vmatmul.mubr.bf16.gmra.mrb[116].mxu1 %v1257_v62  ;;  %3867 = vmatmul.mubr.bf16.gmra.mrb[116].mxu0 %v1601_v63  ;;  %v4813_v62 = vld [vmem:[#allocation2 + $0xc] sm:$0xf] }
 0x131   :  { %3806 = vmatprep.mubr.msk.bf16.mxu1 %vm4385_vm0, %v4384_v0  ;;  %3870 = vmatprep.mubr.msk.bf16.mxu0 %vm4385_vm0, %v4384_v0 }
 0x133   :  { %v4784_v18 = vpop.f32.mrb[12].mxu0  ;;  %v4786_v19 = vpop.f32.mrb[12].mxu1 }
 0x134   :  { %v3572_v23 = vpop.f32.mrb[13].mxu0  ;;  %v3600_v24 = vpop.f32.mrb[13].mxu1 }
 0x135   :  { %v4788_v25 = vpop.f32.mrb[14].mxu0  ;;  %v4792_v28 = vpop.f32.mrb[14].mxu1  ;;  %v1867_v23 = vrot.slane %v4626_v45, 2 }
 0x136   :  { %v3573_v34 = vpop.f32.mrb[15].mxu0  ;;  %v3601_v35 = vpop.f32.mrb[15].mxu1 }
 0x137   :  { %v1868_v45 = vsel %vm1863_vm4, %v1865_v59, %v1867_v23  ;;  %v1869_v59 = vrot.slane %v4638_v60, 2 }
 0x138   :  { %3807 = vmatmul.mubr.bf16.gmra.mrb[120].mxu1 %v1259_v26  ;;  %3871 = vmatmul.mubr.bf16.gmra.mrb[120].mxu0 %v1610_v27  ;;  %v2220_v26 = vrot.slane %v4825_v12, 2  ;;  %v4282_v27 = vld [vmem:[#allocation5 + $0x1c8] sm:$0xff]  }
 0x139   :  { %3810 = vmatprep.mubr.msk.bf16.mxu1 %vm4385_vm0, %v4384_v0  ;;  %3874 = vmatprep.mubr.msk.bf16.mxu0 %vm4385_vm0, %v4384_v0 }
 0x13b   :  { %v4798_v42 = vpop.f32.mrb[16].mxu0  ;;  %v4800_v43 = vpop.f32.mrb[16].mxu1 }
 0x13c   :  { %v3576_v46 = vpop.f32.mrb[17].mxu0  ;;  %v3604_v47 = vpop.f32.mrb[17].mxu1 }
 0x13d   :  { %v4802_v48 = vpop.f32.mrb[18].mxu0  ;;  %v4805_v51 = vpop.f32.mrb[18].mxu1 }
 0x13e   :  { %v3577_v53 = vpop.f32.mrb[19].mxu0  ;;  %v3605_v54 = vpop.f32.mrb[19].mxu1 }
 0x140   :  { %3811 = vmatmul.mubr.bf16.gmra.mrb[124].mxu1 %v1258_v11  ;;  %3875 = vmatmul.mubr.bf16.gmra.mrb[124].mxu0 %v1619_v50  ;;  %v4823_v11 = vcombine.low %v2111_v61, %v4813_v62  ;;  %v4280_v50 = vld [vmem:[#allocation5 + $0x200] sm:$0xff]   ;;  %v2222_v61 = vrot.slane %v4842_v52, 2 }
 0x141   :  { %3878 = vmatprep.mubr.msk.bf16.mxu0 %vm4385_vm0, %v4384_v0  ;;  %3898 = vmatprep.mubr.msk.bf16.mxu1 %vm4385_vm0, %v4384_v0 }
 0x142   :  { %v2219_v24 = vrot.slane %v4823_v11, 2 }
 0x143   :  { %v4815_v63 = vpop.f32.mrb[20].mxu0  ;;  %v4817_v33 = vpop.f32.mrb[20].mxu1 }
 0x144   :  { %v3580_v3 = vpop.f32.mrb[21].mxu0  ;;  %v3608_v6 = vpop.f32.mrb[21].mxu1  ;;  %v2221_v47 = vsel %vm1863_vm4, %v2219_v24, %v2220_v26 }
 0x145   :  { %v4819_v7 = vpop.f32.mrb[22].mxu0  ;;  %v396_v10 = vpop.f32.mrb[22].mxu1  ;;  %v4283_v3 = vld [vmem:[#allocation5 + $0x208] sm:$0xff]  }
 0x146   :  { %v3581_v36 = vpop.f32.mrb[23].mxu0  ;;  %v3609_v15 = vpop.f32.mrb[23].mxu1 }
 0x148   :  { %3879 = vmatmul.mubr.bf16.gmra.mrb[128].mxu0 %v1618_v39  ;;  %3899 = vmatmul.mubr.bf16.vlgmr.msra.gmra.mrb[128].mxu1 %v1866_v8  ;;  %v4289_v8 = vld [vmem:[#allocation5 + $0x1d8] sm:$0xff]  }
 0x149   :  { %3902 = vmatprep.mubr.msk.bf16.mxu1 %vm4385_vm0, %v4384_v0  ;;  %3966 = vmatprep.mubr.msk.bf16.mxu0 %vm4385_vm0, %v4384_v0 }
 0x14a   :  { %4019 = vmatpush3.bf16.msra.mxu1 %v4277_v16 }
 0x14b   :  { %v4834_v29 = vpop.f32.mrb[24].mxu0  ;;  %v731_v30 = vpop.f32.mrb[24].mxu1  ;;  %4020 = vmatprep.subr.bf16.mxu1 %v4384_v0 }
 0x14c   :  { %v833_v34 = vadd.f32 %v731_v30, %v4728_v13  ;;  %v3584_v35 = vpop.f32.mrb[25].mxu0  ;;  %v3628_v39 = vpop.f32.mrb[25].mxu1  ;;  %v4286_v13 = vld [vmem:[#allocation5 + $0x1d0] sm:$0xff]   ;;  %v2223_v30 = vsel %vm1863_vm4, %v2220_v26, %v2222_v61  ;;  %v4291_v26 = vld [vmem:[#allocation5 + $0x218] sm:$0xff]  }
 0x14d   :  { %v4838_v40 = vpop.f32.mrb[26].mxu0  ;;  %v734_v46 = vpop.f32.mrb[26].mxu1  ;;  %v4859_v35 = vld [vmem:[#allocation2 + $0x20] sm:$0xff]  }
 0x14e   :  { %v834_v53 = vadd.f32 %v734_v46, %v4732_v17  ;;  %v3585_v54 = vpop.f32.mrb[27].mxu0  ;;  %v3629_v55 = vpop.f32.mrb[27].mxu1  ;;  %4021 = vmatpush3.bf16.msra.mxu1 %v4282_v27  ;;  %v1870_v27 = vsel %vm1863_vm4, %v1867_v23, %v1869_v59  ;;  %v1871_v23 = vrot.slane %v4652_v9, 2 }
 0x14f   :  { %4022 = vmatprep.subr.bf16.mxu1 %v4384_v0  ;;  %v4297_v54 = vld [vmem:[#allocation5 + $0x1e8] sm:$0xff]  }
 0x150   :  { %3903 = vmatmul.mubr.bf16.gmra.mrb[132].mxu1 %v1868_v45  ;;  %3967 = vmatmul.mubr.bf16.vlgmr.msra.gmra.mrb[132].mxu0 %v2221_v47  ;;  %v4287_v45 = vld [vmem:[#allocation5 + $0x210] sm:$0xff]   ;;  %v4293_v47 = vld [vmem:[#allocation5 + $0x1e0] sm:$0xff]  }
 0x151   :  { %4087 = vmatpush3.bf16.msra.mxu0 %v4280_v50  ;;  %3906 = vmatprep.mubr.msk.bf16.mxu1 %vm4385_vm0, %v4384_v0 }
 0x152   :  { %3970 = vmatprep.mubr.msk.bf16.mxu0 %vm4385_vm0, %v4384_v0  ;;  %4088 = vmatprep.subr.bf16.mxu0 %v4384_v0 }
 0x153   :  { %v739_v17 = vpop.f32.mrb[28].mxu1  ;;  %v1000_v6 = vpop.f32.mrb[28].mxu0  ;;  %4023 = vmatpush3.bf16.msra.mxu1 %v4286_v13 }
 0x154   :  { %v835_v10 = vadd.f32 %v739_v17, %v4747_v31  ;;  %v4854_v36 = vadd.f32 %v1000_v6, %v833_v34  ;;  %v3632_v15 = vpop.f32.mrb[29].mxu1  ;;  %v3696_v16 = vpop.f32.mrb[29].mxu0  ;;  %4024 = vmatprep.subr.bf16.mxu1 %v4384_v0 }
 0x155   :  { %v742_v60 = vpop.f32.mrb[30].mxu1  ;;  %v1003_v24 = vpop.f32.mrb[30].mxu0  ;;  %4089 = vmatpush3.bf16.msra.mxu0 %v4283_v3  ;;  %v4879_v16 = vld [vmem:[#allocation2 + $0x28] sm:$0xff]  }
 0x156   :  { %v836_v39 = vadd.f32 %v742_v60, %v4753_v41  ;;  %v4862_v46 = vadd.f32 %v1003_v24, %v834_v53  ;;  %v3697_v31 = vpop.f32.mrb[31].mxu0  ;;  %v3633_v34 = vpop.f32.mrb[31].mxu1  ;;  %4090 = vmatprep.subr.bf16.mxu0 %v4384_v0  ;;  %v2224_v41 = vrot.slane %v4859_v35, 2 }
 0x157   :  { %4025 = vmatpush3.bf16.msra.mxu1 %v4289_v8  ;;  %v1872_v8 = vsel %vm1863_vm4, %v1869_v59, %v1871_v23  ;;  %v2226_v59 = vrot.slane %v4879_v16, 2  ;;  %v4305_v34 = vld [vmem:[#allocation5 + $0x1f8] sm:$0xff]  }
 0x158   :  { %3907 = vmatmul.mubr.bf16.gmra.mrb[136].mxu1 %v1870_v27  ;;  %3971 = vmatmul.mubr.bf16.gmra.mrb[136].mxu0 %v2223_v30  ;;  %v2225_v15 = vsel %vm1863_vm4, %v2222_v61, %v2224_v41  ;;  %v4300_v30 = vld [vmem:[#allocation5 + $0x1f0] sm:$0xff]   ;;  %v4298_v61 = vld [vmem:[#allocation5 + $0x228] sm:$0xff]  }
 0x159   :  { %3910 = vmatprep.mubr.msk.bf16.mxu1 %vm4385_vm0, %v4384_v0  ;;  %3974 = vmatprep.mubr.msk.bf16.mxu0 %vm4385_vm0, %v4384_v0 }
 0x15a   :  { %4091 = vmatpush3.bf16.msra.mxu0 %v4287_v45  ;;  %4026 = vmatprep.subr.bf16.mxu1 %v4384_v0 }
 0x15b   :  { %v747_v50 = vpop.f32.mrb[32].mxu1  ;;  %v1008_v53 = vpop.f32.mrb[32].mxu0  ;;  %4092 = vmatprep.subr.bf16.mxu0 %v4384_v0  ;;  %4027 = vmatpush3.bf16.msra.mxu1 %v4293_v47 }
 0x15c   :  { %v837_v55 = vadd.f32 %v747_v50, %v4766_v56  ;;  %v4874_v13 = vadd.f32 %v1008_v53, %v835_v10  ;;  %v3636_v3 = vpop.f32.mrb[33].mxu1  ;;  %v3700_v17 = vpop.f32.mrb[33].mxu0  ;;  %4028 = vmatprep.subr.bf16.mxu1 %v4384_v0  ;;  %v4294_v10 = vld [vmem:[#allocation5 + $0x220] sm:$0xff]  }
 0x15d   :  { %v750_v9 = vpop.f32.mrb[34].mxu1  ;;  %v1011_v6 = vpop.f32.mrb[34].mxu0  ;;  %v2227_v3 = vsel %vm1863_vm4, %v2224_v41, %v2226_v59  ;;  %v4899_v17 = vld [vmem:[#allocation2 + $0x30] sm:$0xff]   ;;  %v4306_v41 = vld [vmem:[#allocation5 + $0x238] sm:$0xff]  }
 0x15e   :  { %v838_v60 = vadd.f32 %v750_v9, %v4772_v1  ;;  %v4882_v24 = vadd.f32 %v1011_v6, %v836_v39  ;;  %v3701_v27 = vpop.f32.mrb[35].mxu0  ;;  %v3637_v56 = vpop.f32.mrb[35].mxu1  ;;  %4093 = vmatpush3.bf16.msra.mxu0 %v4291_v26  ;;  %v1873_v1 = vrot.slane %v4667_v22, 2 }
 0x15f   :  { %4094 = vmatprep.subr.bf16.mxu0 %v4384_v0  ;;  %4029 = vmatpush3.bf16.msra.mxu1 %v4297_v54 }
 0x160   :  { %3911 = vmatmul.mubr.bf16.gmra.mrb[140].mxu1 %v1872_v8  ;;  %3975 = vmatmul.mubr.bf16.gmra.mrb[140].mxu0 %v2225_v15  ;;  %v1874_v54 = vsel %vm1863_vm4, %v1871_v23, %v1873_v1  ;;  %v1875_v23 = vrot.slane %v4682_v37, 2 }
 0x161   :  { %3914 = vmatprep.mubr.msk.bf16.mxu1 %vm4385_vm0, %v4384_v0  ;;  %3978 = vmatprep.mubr.msk.bf16.mxu0 %vm4385_vm0, %v4384_v0 }
 0x162   :  { %4095 = vmatpush3.bf16.msra.mxu0 %v4294_v10  ;;  %4030 = vmatprep.subr.bf16.mxu1 %v4384_v0 }
 0x163   :  { %v755_v39 = vpop.f32.mrb[36].mxu1  ;;  %v1016_v31 = vpop.f32.mrb[36].mxu0  ;;  %4096 = vmatprep.subr.bf16.mxu0 %v4384_v0  ;;  %4031 = vmatpush3.bf16.msra.mxu1 %v4300_v30 }
 0x164   :  { %v839_v45 = vadd.f32 %v755_v39, %v4784_v18  ;;  %v4894_v47 = vadd.f32 %v1016_v31, %v837_v55  ;;  %v3640_v26 = vpop.f32.mrb[37].mxu1  ;;  %v3704_v50 = vpop.f32.mrb[37].mxu0  ;;  %4032 = vmatprep.subr.bf16.mxu1 %v4384_v0  ;;  %v4301_v55 = vld [vmem:[#allocation5 + $0x230] sm:$0xff]   ;;  %v1876_v31 = vsel %vm1863_vm4, %v1873_v1, %v1875_v23 }
 0x165   :  { %v758_v22 = vpop.f32.mrb[38].mxu1  ;;  %v1019_v53 = vpop.f32.mrb[38].mxu0 }
 0x166   :  { %v840_v9 = vadd.f32 %v758_v22, %v4788_v25  ;;  %v4902_v6 = vadd.f32 %v1019_v53, %v838_v60  ;;  %v3705_v8 = vpop.f32.mrb[39].mxu0  ;;  %v3641_v18 = vpop.f32.mrb[39].mxu1  ;;  %4097 = vmatpush3.bf16.msra.mxu0 %v4298_v61  ;;  %v2228_v25 = vrot.slane %v4899_v17, 2 }
 0x167   :  { %4098 = vmatprep.subr.bf16.mxu0 %v4384_v0  ;;  %4033 = vmatpush3.bf16.msra.mxu1 %v4305_v34  ;;  %v4917_v34 = vld [vmem:[#allocation2 + $0x38] sm:$0xff]  }
 0x168   :  { %3915 = vmatmul.mubr.bf16.gmra.mrb[144].mxu1 %v1874_v54  ;;  %3979 = vmatmul.mubr.bf16.gmra.mrb[144].mxu0 %v2227_v3  ;;  %v2229_v37 = vsel %vm1863_vm4, %v2226_v59, %v2228_v25  ;;  %v2230_v1 = vrot.slane %v4917_v34, 2 }
 0x169   :  { %3918 = vmatprep.mubr.msk.bf16.mxu1 %vm4385_vm0, %v4384_v0  ;;  %3982 = vmatprep.mubr.msk.bf16.mxu0 %vm4385_vm0, %v4384_v0 }
 0x16a   :  { %4099 = vmatpush3.bf16.msra.mxu0 %v4301_v55 }
 0x16b   :  { %v763_v15 = vpop.f32.mrb[40].mxu1  ;;  %v1024_v60 = vpop.f32.mrb[40].mxu0  ;;  %4100 = vmatprep.subr.bf16.mxu0 %v4384_v0 }
 0x16c   :  { %v841_v27 = vadd.f32 %v763_v15, %v4798_v42  ;;  %v4913_v56 = vadd.f32 %v1024_v60, %v839_v45  ;;  %v3644_v10 = vpop.f32.mrb[41].mxu1  ;;  %v3708_v30 = vpop.f32.mrb[41].mxu0  ;;  %v1877_v42 = vrot.slane %v4696_v49, 2  ;;  %v4933_v15 = vld [vmem:[#allocation2 + $0x40] sm:$0xff]  }
 0x16d   :  { %v766_v61 = vpop.f32.mrb[42].mxu1  ;;  %v1027_v39 = vpop.f32.mrb[42].mxu0 }
 0x16e   :  { %v842_v26 = vadd.f32 %v766_v61, %v4802_v48  ;;  %v4920_v50 = vadd.f32 %v1027_v39, %v840_v9  ;;  %v3709_v22 = vpop.f32.mrb[43].mxu0  ;;  %v3645_v53 = vpop.f32.mrb[43].mxu1  ;;  %4101 = vmatpush3.bf16.msra.mxu0 %v4306_v41  ;;  %v1878_v55 = vsel %vm1863_vm4, %v1875_v23, %v1877_v42  ;;  %v2231_v41 = vsel %vm1863_vm4, %v2228_v25, %v2230_v1 }
 0x16f   :  { %v2232_v23 = vrot.slane %v4933_v15, 2 }
 0x170   :  { %3919 = vmatmul.mubr.bf16.gmra.mrb[148].mxu1 %v1876_v31  ;;  %3983 = vmatmul.mubr.bf16.gmra.mrb[148].mxu0 %v2229_v37 }
 0x171   :  { %3922 = vmatprep.mubr.msk.bf16.mxu1 %vm4385_vm0, %v4384_v0  ;;  %3986 = vmatprep.mubr.msk.bf16.mxu0 %vm4385_vm0, %v4384_v0  ;;  %v2233_v53 = vsel %vm1863_vm4, %v2230_v1, %v2232_v23 }
 0x173   :  { %v771_v59 = vpop.f32.mrb[44].mxu1  ;;  %v1032_v45 = vpop.f32.mrb[44].mxu0 }
 0x174   :  { %v843_v48 = vadd.f32 %v771_v59, %v4815_v63  ;;  %v4929_v54 = vadd.f32 %v1032_v45, %v841_v27  ;;  %v3648_v3 = vpop.f32.mrb[45].mxu1  ;;  %v3712_v9 = vpop.f32.mrb[45].mxu0  ;;  %v1879_v63 = vrot.slane %v4708_v58, 2  ;;  %v4949_v59 = vld [vmem:[#allocation2 + $0x48] sm:$0xff]  }
 0x175   :  { %v774_v8 = vpop.f32.mrb[46].mxu1  ;;  %v1035_v18 = vpop.f32.mrb[46].mxu0 }
 0x176   :  { %v844_v49 = vadd.f32 %v774_v8, %v4819_v7  ;;  %v4936_v60 = vadd.f32 %v1035_v18, %v842_v26  ;;  %v3713_v10 = vpop.f32.mrb[47].mxu0  ;;  %v3649_v30 = vpop.f32.mrb[47].mxu1  ;;  %v1880_v22 = vsel %vm1863_vm4, %v1877_v42, %v1879_v63  ;;  %v2234_v42 = vrot.slane %v4949_v59, 2 }
 0x178   :  { %3923 = vmatmul.mubr.bf16.gmra.mrb[152].mxu1 %v1878_v55  ;;  %3987 = vmatmul.mubr.bf16.gmra.mrb[152].mxu0 %v2231_v41  ;;  %v2235_v30 = vsel %vm1863_vm4, %v2232_v23, %v2234_v42 }
 0x179   :  { %3926 = vmatprep.mubr.msk.bf16.mxu1 %vm4385_vm0, %v4384_v0  ;;  %3990 = vmatprep.mubr.msk.bf16.mxu0 %vm4385_vm0, %v4384_v0 }
 0x17b   :  { %v779_v25 = vpop.f32.mrb[48].mxu1  ;;  %v1040_v27 = vpop.f32.mrb[48].mxu0 }
 0x17c   :  { %v845_v7 = vadd.f32 %v779_v25, %v4834_v29  ;;  %v4945_v61 = vadd.f32 %v1040_v27, %v843_v48  ;;  %v3652_v39 = vpop.f32.mrb[49].mxu1  ;;  %v3716_v31 = vpop.f32.mrb[49].mxu0  ;;  %v1881_v29 = vrot.slane %v4719_v5, 2  ;;  %v4965_v25 = vld [vmem:[#allocation2 + $0x50] sm:$0xff]  }
 0x17d   :  { %v782_v37 = vpop.f32.mrb[50].mxu1  ;;  %v1043_v26 = vpop.f32.mrb[50].mxu0 }
 0x17e   :  { %v846_v58 = vadd.f32 %v782_v37, %v4838_v40  ;;  %v4952_v45 = vadd.f32 %v1043_v26, %v844_v49  ;;  %v3717_v3 = vpop.f32.mrb[51].mxu0  ;;  %v3653_v9 = vpop.f32.mrb[51].mxu1  ;;  %v1882_v10 = vsel %vm1863_vm4, %v1879_v63, %v1881_v29  ;;  %v2236_v63 = vrot.slane %v4965_v25, 2 }
 0x180   :  { %3927 = vmatmul.mubr.bf16.gmra.mrb[156].mxu1 %v1880_v22  ;;  %3991 = vmatmul.mubr.bf16.gmra.mrb[156].mxu0 %v2233_v53  ;;  %v2237_v9 = vsel %vm1863_vm4, %v2234_v42, %v2236_v63 }
 0x181   :  { %3930 = vmatprep.mubr.msk.bf16.mxu1 %vm4385_vm0, %v4384_v0  ;;  %3994 = vmatprep.mubr.msk.bf16.mxu0 %vm4385_vm0, %v4384_v0 }
 0x183   :  { %v787_v1 = vpop.f32.mrb[52].mxu1  ;;  %v1048_v48 = vpop.f32.mrb[52].mxu0 }
 0x184   :  { %v847_v40 = vadd.f32 %v787_v1, %v4730_v14  ;;  %v4961_v8 = vadd.f32 %v1048_v48, %v845_v7  ;;  %v3656_v18 = vpop.f32.mrb[53].mxu1  ;;  %v3720_v55 = vpop.f32.mrb[53].mxu0  ;;  %v1883_v14 = vrot.slane %v4738_v21, 2  ;;  %v4981_v1 = vld [vmem:[#allocation2 + $0x58] sm:$0xff]  }
 0x185   :  { %v790_v41 = vpop.f32.mrb[54].mxu1  ;;  %v1051_v49 = vpop.f32.mrb[54].mxu0 }
 0x186   :  { %v848_v5 = vadd.f32 %v790_v41, %v4736_v20  ;;  %v4968_v27 = vadd.f32 %v1051_v49, %v846_v58  ;;  %v3721_v39 = vpop.f32.mrb[55].mxu0  ;;  %v3657_v31 = vpop.f32.mrb[55].mxu1  ;;  %v1884_v3 = vsel %vm1863_vm4, %v1881_v29, %v1883_v14  ;;  %v2238_v29 = vrot.slane %v4981_v1, 2 }
 0x188   :  { %3931 = vmatmul.mubr.bf16.gmra.mrb[160].mxu1 %v1882_v10  ;;  %3995 = vmatmul.mubr.bf16.gmra.mrb[160].mxu0 %v2235_v30  ;;  %v2239_v31 = vsel %vm1863_vm4, %v2236_v63, %v2238_v29  ;;  %v5008_v63 = vld [vmem:[#allocation2 + $0x68] sm:$0xf] }
 0x189   :  { %3934 = vmatprep.mubr.msk.bf16.mxu1 %vm4385_vm0, %v4384_v0  ;;  %3998 = vmatprep.mubr.msk.bf16.mxu0 %vm4385_vm0, %v4384_v0 }
 0x18b   :  { %v795_v23 = vpop.f32.mrb[56].mxu1  ;;  %v1056_v7 = vpop.f32.mrb[56].mxu0 }
 0x18c   :  { %v849_v20 = vadd.f32 %v795_v23, %v4749_v32  ;;  %v4977_v37 = vadd.f32 %v1056_v7, %v847_v40  ;;  %v3660_v26 = vpop.f32.mrb[57].mxu1  ;;  %v3724_v22 = vpop.f32.mrb[57].mxu0  ;;  %v1885_v32 = vrot.slane %v4751_v38, 2  ;;  %v4997_v23 = vld [vmem:[#allocation2 + $0x60] sm:$0xff]  }
 0x18d   :  { %v798_v53 = vpop.f32.mrb[58].mxu1  ;;  %v1059_v58 = vpop.f32.mrb[58].mxu0 }
 0x18e   :  { %v850_v21 = vadd.f32 %v798_v53, %v4757_v44  ;;  %v4984_v48 = vadd.f32 %v1059_v58, %v848_v5  ;;  %v3725_v18 = vpop.f32.mrb[59].mxu0  ;;  %v3661_v55 = vpop.f32.mrb[59].mxu1  ;;  %v1886_v39 = vsel %vm1863_vm4, %v1883_v14, %v1885_v32  ;;  %v2240_v14 = vrot.slane %v4997_v23, 2 }
 0x190   :  { %3935 = vmatmul.mubr.bf16.gmra.mrb[164].mxu1 %v1884_v3  ;;  %3999 = vmatmul.mubr.bf16.gmra.mrb[164].mxu0 %v2237_v9 }
 0x191   :  { %3938 = vmatprep.mubr.msk.bf16.mxu1 %vm4385_vm0, %v4384_v0  ;;  %4002 = vmatprep.mubr.msk.bf16.mxu0 %vm4385_vm0, %v4384_v0 }
 0x193   :  { %v803_v42 = vpop.f32.mrb[60].mxu1  ;;  %v1064_v40 = vpop.f32.mrb[60].mxu0 }
 0x194   :  { %v851_v44 = vadd.f32 %v803_v42, %v4768_v57  ;;  %v4993_v41 = vadd.f32 %v1064_v40, %v849_v20  ;;  %v3664_v49 = vpop.f32.mrb[61].mxu1  ;;  %v3728_v10 = vpop.f32.mrb[61].mxu0  ;;  %v1887_v57 = vrot.slane %v4776_v4, 2  ;;  %v2136_v20 = vld [vmem:[#allocation2 + $0x6c] sm:$0x3]  ;;  %v2241_v4 = vsel %vm1863_vm4, %v2238_v29, %v2240_v14 }
 0x195   :  { %v806_v30 = vpop.f32.mrb[62].mxu1  ;;  %v1067_v5 = vpop.f32.mrb[62].mxu0  ;;  %v3325_v18 = vcombine.low %v5008_v63, %v2136_v20  ;;  %v2497_v29 = vshrl.u32 %v4825_v12, 16 }
 0x196   :  { %v852_v38 = vadd.f32 %v806_v30, %v4774_v2  ;;  %v5000_v7 = vadd.f32 %v1067_v5, %v850_v21  ;;  %v3729_v26 = vpop.f32.mrb[63].mxu0  ;;  %v3665_v22 = vpop.f32.mrb[63].mxu1  ;;  %v1888_v40 = vsel %vm1863_vm4, %v1885_v32, %v1887_v57  ;;  %v2492_v32 = vshll.u32 %v4823_v11, 16 }
 0x198   :  { %3939 = vmatmul.mubr.bf16.gmra.mrb[168].mxu1 %v1886_v39  ;;  %4003 = vmatmul.mubr.bf16.gmra.mrb[168].mxu0 %v2239_v31 }
 0x199   :  { %3942 = vmatprep.mubr.msk.bf16.mxu1 %vm4385_vm0, %v4384_v0  ;;  %4006 = vmatprep.mubr.msk.bf16.mxu0 %vm4385_vm0, %v4384_v0 }
 0x19b   :  { %v811_v2 = vpop.f32.mrb[64].mxu1  ;;  %v1072_v53 = vpop.f32.mrb[64].mxu0 }
 0x19c   :  { %v853_v58 = vadd.f32 %v811_v2, %v4786_v19  ;;  %v5011_v3 = vadd.f32 %v1072_v53, %v851_v44  ;;  %v3668_v9 = vpop.f32.mrb[65].mxu1  ;;  %v3732_v21 = vpop.f32.mrb[65].mxu0  ;;  %v2242_v19 = vrot.slane %v3325_v18, 2  ;;  %v2489_v44 = vshrl.u32 %v4823_v11, 16 }
 0x19d   :  { %v814_v55 = vpop.f32.mrb[66].mxu1  ;;  %v1075_v42 = vpop.f32.mrb[66].mxu0  ;;  %v2494_v18 = vrot.slane %v2492_v32, 3 }
 0x19e   :  { %v854_v49 = vadd.f32 %v814_v55, %v4792_v28  ;;  %v5017_v10 = vadd.f32 %v1075_v42, %v852_v38  ;;  %v3733_v30 = vpop.f32.mrb[67].mxu0  ;;  %v3669_v5 = vpop.f32.mrb[67].mxu1  ;;  %v2500_v28 = vshll.u32 %v4825_v12, 16  ;;  %v2243_v2 = vsel %vm1863_vm4, %v2240_v14, %v2242_v19 }
 0x19f   :  { %v2491_v21 = vrot.slane %v2489_v44, 2  ;;  %v2499_v55 = vrot.slane %v2497_v29, 2 }
 0x1a0   :  { %3943 = vmatmul.mubr.bf16.gmra.mrb[172].mxu1 %v1888_v40  ;;  %4007 = vmatmul.mubr.bf16.gmra.mrb[172].mxu0 %v2241_v4  ;;  %v2502_v11 = vrot.slane %v2500_v28, 3 }
 0x1a1   :  { %3946 = vmatprep.mubr.msk.bf16.mxu1 %vm4385_vm0, %v4384_v0  ;;  %4010 = vmatprep.mubr.msk.bf16.mxu0 %vm4385_vm0, %v4384_v0  ;;  %v2495_v14 = vor.u32 %v2494_v18, %v2491_v21 }
 0x1a2   :  { %v2503_v5 = vor.u32 %v2502_v11, %v2499_v55  ;;  %v2515_v11 = vshrl.u32 %v4859_v35, 16 }
 0x1a3   :  { %v819_v39 = vpop.f32.mrb[68].mxu1  ;;  %v1080_v31 = vpop.f32.mrb[68].mxu0 }
 0x1a4   :  { %v855_v38 = vadd.f32 %v819_v39, %v4800_v43  ;;  %v5028_v26 = vadd.f32 %v1080_v31, %v853_v58  ;;  %v3672_v22 = vpop.f32.mrb[69].mxu1  ;;  %v3736_v20 = vpop.f32.mrb[69].mxu0  ;;  %v2506_v43 = vshrl.u32 %v4842_v52, 16  ;;  %v2509_v58 = vshll.u32 %v4842_v52, 16 }
 0x1a5   :  { %v822_v53 = vpop.f32.mrb[70].mxu1  ;;  %v1083_v9 = vpop.f32.mrb[70].mxu0  ;;  %v2504_v20 = vsel %vm2487_vm5, %v2495_v14, %v2503_v5 }
 0x1a6   :  { %v856_v42 = vadd.f32 %v822_v53, %v4805_v51  ;;  %v5032_v40 = vadd.f32 %v1083_v9, %v854_v49  ;;  %v3737_v4 = vpop.f32.mrb[71].mxu0  ;;  %v3673_v30 = vpop.f32.mrb[71].mxu1  ;;  %v2826_v51 = vld [vmem:[#allocation2 + $0x8] sm:$0x8]  ;;  %v2508_v39 = vrot.slane %v2506_v43, 2  ;;  %v2511_v31 = vrot.slane %v2509_v58, 3 }
 0x1a7   :  { %v3343_v53 = vcombine.low %v2826_v51, %v4813_v62  ;;  %v2518_v62 = vshll.u32 %v4859_v35, 16 }
 0x1a8   :  { %3947 = vmatmul.mubr.bf16.gmra.mrb[176].mxu1 %v1887_v57  ;;  %4011 = vmatmul.mubr.bf16.gmra.mrb[176].mxu0 %v2243_v2  ;;  %v2512_v55 = vor.u32 %v2511_v31, %v2508_v39 }
 0x1a9   :  { %4014 = vmatprep.mubr.msk.bf16.mxu0 %vm4385_vm0, %v4384_v0  ;;  %4034 = vmatprep.mubr.msk.bf16.mxu1 %vm4385_vm0, %v4384_v0 }
 0x1ab   :  { %v827_v49 = vpop.f32.mrb[72].mxu1  ;;  %v1088_v44 = vpop.f32.mrb[72].mxu0 }
 0x1ac   :  { %v857_v32 = vadd.f32 %v827_v49, %v4817_v33  ;;  %v5041_v57 = vadd.f32 %v1088_v44, %v855_v38  ;;  %v3740_v29 = vpop.f32.mrb[73].mxu0  ;;  %v3676_v28 = vpop.f32.mrb[73].mxu1  ;;  %v2848_v33 = vrot.slane %v3343_v53, 3  ;;  %v2849_v38 = vrot.slane %v4825_v12, 3 }
 0x1ad   :  { %v1091_v22 = vpop.f32.mrb[74].mxu0  ;;  %v830_v2 = vpop.f32.mrb[74].mxu1  ;;  %v2513_v49 = vsel %vm2487_vm5, %v2503_v5, %v2512_v55  ;;  %v2517_v12 = vrot.slane %v2515_v11, 2  ;;  %v2520_v29 = vrot.slane %v2518_v62, 3  ;;  %v2524_v5 = vshrl.u32 %v4879_v16, 16 }
 0x1ae   :  { %v5045_v9 = vadd.f32 %v1091_v22, %v856_v42  ;;  %v3741_v21 = vpop.f32.mrb[75].mxu0  ;;  %v3677_v18 = vpop.f32.mrb[75].mxu1  ;;  %v2850_v44 = vsel %vm2847_vm6, %v2848_v33, %v2849_v38  ;;  %v2527_v22 = vshll.u32 %v4879_v16, 16 }
 0x1b0   :  { %4015 = vmatmul.mubr.bf16.gmra.mrb[180].mxu0 %v2242_v19  ;;  %4035 = vmatmul.mubr.bf16.vlgmr.msra.gmra.mrb[180].mxu1 %v2504_v20 }
 0x1b1   :  { %4038 = vmatprep.mubr.msk.bf16.mxu1 %vm4385_vm0, %v4384_v0  ;;  %4102 = vmatprep.mubr.msk.bf16.mxu0 %vm4385_vm0, %v4384_v0 }
 0x1b3   :  { %v1096_v42 = vpop.f32.mrb[76].mxu0  ;;  %v1355_v4 = vpop.f32.mrb[76].mxu1 }
 0x1b4   :  { %v5054_v30 = vadd.f32 %v1096_v42, %v857_v32  ;;  %v1457_v19 = vadd.f32 %v1355_v4, %v4854_v36  ;;  %v3744_v43 = vpop.f32.mrb[77].mxu0  ;;  %v3764_v58 = vpop.f32.mrb[77].mxu1  ;;  %v2521_v36 = vor.u32 %v2520_v29, %v2517_v12  ;;  %v2851_v32 = vrot.slane %v4842_v52, 3 }
 0x1b5   :  { %v1099_v14 = vpop.f32.mrb[78].mxu0  ;;  %v1358_v51 = vpop.f32.mrb[78].mxu1  ;;  %v2526_v4 = vrot.slane %v2524_v5, 2  ;;  %v2529_v52 = vrot.slane %v2527_v22, 3 }
 0x1b6   :  { %v1458_v28 = vadd.f32 %v1358_v51, %v4862_v46  ;;  %v3745_v39 = vpop.f32.mrb[79].mxu0  ;;  %v3765_v31 = vpop.f32.mrb[79].mxu1  ;;  %v2522_v62 = vsel %vm2487_vm5, %v2512_v55, %v2521_v36  ;;  %v2852_v42 = vsel %vm2847_vm6, %v2849_v38, %v2851_v32  ;;  %v2853_v55 = vrot.slane %v4859_v35, 3 }
 0x1b7   :  { %v2533_v38 = vshrl.u32 %v4899_v17, 16 }
 0x1b8   :  { %4039 = vmatmul.mubr.bf16.gmra.mrb[184].mxu1 %v2513_v49  ;;  %4103 = vmatmul.mubr.bf16.vlgmr.msra.gmra.mrb[184].mxu0 %v2850_v44  ;;  %v2854_v22 = vsel %vm2847_vm6, %v2851_v32, %v2853_v55  ;;  %v2542_v32 = vshrl.u32 %v4917_v34, 16 }
 0x1b9   :  { %4042 = vmatprep.mubr.msk.bf16.mxu1 %vm4385_vm0, %v4384_v0  ;;  %4106 = vmatprep.mubr.msk.bf16.mxu0 %vm4385_vm0, %v4384_v0 }
 0x1bb   :  { %v1363_v20 = vpop.f32.mrb[80].mxu1  ;;  %v1715_v2 = vpop.f32.mrb[80].mxu0 }
 0x1bc   :  { %v1459_v46 = vadd.f32 %v1363_v20, %v4874_v13  ;;  %v5068_v53 = vadd.f32 %v1715_v2, %v1457_v19  ;;  %v3768_v21 = vpop.f32.mrb[81].mxu1  ;;  %v3832_v18 = vpop.f32.mrb[81].mxu0  ;;  %v2530_v13 = vor.u32 %v2529_v52, %v2526_v4  ;;  %v2536_v19 = vshll.u32 %v4899_v17, 16 }
 0x1bd   :  { %v1366_v33 = vpop.f32.mrb[82].mxu1  ;;  %v1718_v11 = vpop.f32.mrb[82].mxu0  ;;  %v2535_v20 = vrot.slane %v2533_v38, 2 }
 0x1be   :  { %v1460_v43 = vadd.f32 %v1366_v33, %v4882_v24  ;;  %v5073_v58 = vadd.f32 %v1718_v11, %v1458_v28  ;;  %v3833_v14 = vpop.f32.mrb[83].mxu0  ;;  %v3769_v51 = vpop.f32.mrb[83].mxu1  ;;  %v2531_v5 = vsel %vm2487_vm5, %v2521_v36, %v2530_v13  ;;  %v2538_v35 = vrot.slane %v2536_v19, 3 }
 0x1bf   :  { %v2855_v36 = vrot.slane %v4879_v16, 3  ;;  %v2544_v19 = vrot.slane %v2542_v32, 2 }
 0x1c0   :  { %4043 = vmatmul.mubr.bf16.gmra.mrb[188].mxu1 %v2522_v62  ;;  %4107 = vmatmul.mubr.bf16.gmra.mrb[188].mxu0 %v2852_v42 }
 0x1c1   :  { %4046 = vmatprep.mubr.msk.bf16.mxu1 %vm4385_vm0, %v4384_v0  ;;  %4110 = vmatprep.mubr.msk.bf16.mxu0 %vm4385_vm0, %v4384_v0  ;;  %v2856_v38 = vsel %vm2847_vm6, %v2853_v55, %v2855_v36  ;;  %v2551_v55 = vshrl.u32 %v4933_v15, 16 }
 0x1c3   :  { %v1371_v24 = vpop.f32.mrb[84].mxu1  ;;  %v1723_v49 = vpop.f32.mrb[84].mxu0  ;;  %v2553_v32 = vrot.slane %v2551_v55, 2 }
 0x1c4   :  { %v1461_v44 = vadd.f32 %v1371_v24, %v4894_v47  ;;  %v5083_v12 = vadd.f32 %v1723_v49, %v1459_v46  ;;  %v3772_v29 = vpop.f32.mrb[85].mxu1  ;;  %v3836_v28 = vpop.f32.mrb[85].mxu0  ;;  %v2539_v47 = vor.u32 %v2538_v35, %v2535_v20  ;;  %v2545_v46 = vshll.u32 %v4917_v34, 16 }
 0x1c5   :  { %v1374_v39 = vpop.f32.mrb[86].mxu1  ;;  %v1726_v31 = vpop.f32.mrb[86].mxu0 }
 0x1c6   :  { %v1462_v2 = vadd.f32 %v1374_v39, %v4902_v6  ;;  %v5088_v21 = vadd.f32 %v1726_v31, %v1460_v43  ;;  %v3837_v18 = vpop.f32.mrb[87].mxu0  ;;  %v3773_v33 = vpop.f32.mrb[87].mxu1  ;;  %v2540_v51 = vsel %vm2487_vm5, %v2530_v13, %v2539_v47  ;;  %v2547_v16 = vrot.slane %v2545_v46, 3 }
 0x1c7   :  { %v2857_v13 = vrot.slane %v4899_v17, 3 }
 0x1c8   :  { %4047 = vmatmul.mubr.bf16.gmra.mrb[192].mxu1 %v2531_v5  ;;  %4111 = vmatmul.mubr.bf16.gmra.mrb[192].mxu0 %v2854_v22 }
 0x1c9   :  { %4050 = vmatprep.mubr.msk.bf16.mxu1 %vm4385_vm0, %v4384_v0  ;;  %4114 = vmatprep.mubr.msk.bf16.mxu0 %vm4385_vm0, %v4384_v0  ;;  %v2858_v33 = vsel %vm2847_vm6, %v2855_v36, %v2857_v13  ;;  %v2560_v36 = vshrl.u32 %v4949_v59, 16 }
 0x1cb   :  { %v1379_v6 = vpop.f32.mrb[88].mxu1  ;;  %v1731_v11 = vpop.f32.mrb[88].mxu0 }
 0x1cc   :  { %v1463_v62 = vadd.f32 %v1379_v6, %v4913_v56  ;;  %v5098_v42 = vadd.f32 %v1731_v11, %v1461_v44  ;;  %v3776_v4 = vpop.f32.mrb[89].mxu1  ;;  %v3840_v52 = vpop.f32.mrb[89].mxu0  ;;  %v2548_v56 = vor.u32 %v2547_v16, %v2544_v19  ;;  %v2554_v44 = vshll.u32 %v4933_v15, 16 }
 0x1cd   :  { %v1382_v43 = vpop.f32.mrb[90].mxu1  ;;  %v1734_v14 = vpop.f32.mrb[90].mxu0 }
 0x1ce   :  { %v1464_v24 = vadd.f32 %v1382_v43, %v4920_v50  ;;  %v5103_v49 = vadd.f32 %v1734_v14, %v1462_v2  ;;  %v3841_v29 = vpop.f32.mrb[91].mxu0  ;;  %v3777_v28 = vpop.f32.mrb[91].mxu1  ;;  %v2549_v18 = vsel %vm2487_vm5, %v2539_v47, %v2548_v56  ;;  %v2556_v17 = vrot.slane %v2554_v44, 3 }
 0x1cf   :  { %v2859_v47 = vrot.slane %v4917_v34, 3  ;;  %v2562_v28 = vrot.slane %v2560_v36, 2 }
 0x1d0   :  { %4051 = vmatmul.mubr.bf16.gmra.mrb[196].mxu1 %v2540_v51  ;;  %4115 = vmatmul.mubr.bf16.gmra.mrb[196].mxu0 %v2856_v38 }
 0x1d1   :  { %4054 = vmatprep.mubr.msk.bf16.mxu1 %vm4385_vm0, %v4384_v0  ;;  %4118 = vmatprep.mubr.msk.bf16.mxu0 %vm4385_vm0, %v4384_v0  ;;  %v2860_v29 = vsel %vm2847_vm6, %v2857_v13, %v2859_v47  ;;  %v2569_v13 = vshrl.u32 %v4965_v25, 16 }
 0x1d3   :  { %v1387_v50 = vpop.f32.mrb[92].mxu1  ;;  %v1739_v39 = vpop.f32.mrb[92].mxu0 }
 0x1d4   :  { %v1465_v31 = vadd.f32 %v1387_v50, %v4929_v54  ;;  %v5113_v5 = vadd.f32 %v1739_v39, %v1463_v62  ;;  %v3780_v22 = vpop.f32.mrb[93].mxu1  ;;  %v3844_v20 = vpop.f32.mrb[93].mxu0  ;;  %v2557_v54 = vor.u32 %v2556_v17, %v2553_v32  ;;  %v2563_v62 = vshll.u32 %v4949_v59, 16 }
 0x1d5   :  { %v1390_v35 = vpop.f32.mrb[94].mxu1  ;;  %v1742_v2 = vpop.f32.mrb[94].mxu0 }
 0x1d6   :  { %v1466_v46 = vadd.f32 %v1390_v35, %v4936_v60  ;;  %v5118_v6 = vadd.f32 %v1742_v2, %v1464_v24  ;;  %v3845_v11 = vpop.f32.mrb[95].mxu0  ;;  %v3781_v4 = vpop.f32.mrb[95].mxu1  ;;  %v2558_v24 = vsel %vm2487_vm5, %v2548_v56, %v2557_v54  ;;  %v2565_v34 = vrot.slane %v2563_v62, 3 }
 0x1d7   :  { %v2861_v56 = vrot.slane %v4933_v15, 3  ;;  %v2571_v11 = vrot.slane %v2569_v13, 2 }
 0x1d8   :  { %4055 = vmatmul.mubr.bf16.gmra.mrb[200].mxu1 %v2549_v18  ;;  %4119 = vmatmul.mubr.bf16.gmra.mrb[200].mxu0 %v2858_v33 }
 0x1d9   :  { %4058 = vmatprep.mubr.msk.bf16.mxu1 %vm4385_vm0, %v4384_v0  ;;  %4122 = vmatprep.mubr.msk.bf16.mxu0 %vm4385_vm0, %v4384_v0 }
 0x1db   :  { %v1395_v60 = vpop.f32.mrb[96].mxu1  ;;  %v1747_v52 = vpop.f32.mrb[96].mxu0 }
 0x1dc   :  { %v1467_v43 = vadd.f32 %v1395_v60, %v4945_v61  ;;  %v5128_v14 = vadd.f32 %v1747_v52, %v1465_v31  ;;  %v3784_v51 = vpop.f32.mrb[97].mxu1  ;;  %v3848_v38 = vpop.f32.mrb[97].mxu0  ;;  %v2566_v61 = vor.u32 %v2565_v34, %v2562_v28  ;;  %v2572_v31 = vshll.u32 %v4965_v25, 16 }
 0x1dd   :  { %v1398_v19 = vpop.f32.mrb[98].mxu1  ;;  %v1750_v16 = vpop.f32.mrb[98].mxu0  ;;  %v2581_v52 = vshll.u32 %v4981_v1, 16 }
 0x1de   :  { %v1468_v55 = vadd.f32 %v1398_v19, %v4952_v45  ;;  %v5133_v44 = vadd.f32 %v1750_v16, %v1466_v46  ;;  %v3849_v50 = vpop.f32.mrb[99].mxu0  ;;  %v3785_v39 = vpop.f32.mrb[99].mxu1  ;;  %v2567_v17 = vsel %vm2487_vm5, %v2557_v54, %v2566_v61  ;;  %v2862_v46 = vsel %vm2847_vm6, %v2859_v47, %v2861_v56 }
 0x1df   :  { %v2574_v15 = vrot.slane %v2572_v31, 3  ;;  %v2863_v54 = vrot.slane %v4949_v59, 3  ;;  %v2578_v47 = vshrl.u32 %v4981_v1, 16  ;;  %v2583_v59 = vrot.slane %v2581_v52, 3 }
 0x1e0   :  { %4059 = vmatmul.mubr.bf16.gmra.mrb[204].mxu1 %v2558_v24  ;;  %4123 = vmatmul.mubr.bf16.gmra.mrb[204].mxu0 %v2860_v29 }
 0x1e1   :  { %4062 = vmatprep.mubr.msk.bf16.mxu1 %vm4385_vm0, %v4384_v0  ;;  %4126 = vmatprep.mubr.msk.bf16.mxu0 %vm4385_vm0, %v4384_v0  ;;  %v2864_v34 = vsel %vm2847_vm6, %v2861_v56, %v2863_v54  ;;  %v2865_v56 = vrot.slane %v4965_v25, 3 }
 0x1e3   :  { %v1403_v45 = vpop.f32.mrb[100].mxu1  ;;  %v1755_v22 = vpop.f32.mrb[100].mxu0  ;;  %v2866_v25 = vsel %vm2847_vm6, %v2863_v54, %v2865_v56 }
 0x1e4   :  { %v1469_v20 = vadd.f32 %v1403_v45, %v4961_v8  ;;  %v5143_v35 = vadd.f32 %v1755_v22, %v1467_v43  ;;  %v3788_v2 = vpop.f32.mrb[101].mxu1  ;;  %v3852_v18 = vpop.f32.mrb[101].mxu0  ;;  %v2575_v8 = vor.u32 %v2574_v15, %v2571_v11  ;;  %v2587_v45 = vshrl.u32 %v4997_v23, 16 }
 0x1e5   :  { %v1406_v33 = vpop.f32.mrb[102].mxu1  ;;  %v1758_v32 = vpop.f32.mrb[102].mxu0 }
 0x1e6   :  { %v1470_v4 = vadd.f32 %v1406_v33, %v4968_v27  ;;  %v5148_v36 = vadd.f32 %v1758_v32, %v1468_v55  ;;  %v3853_v62 = vpop.f32.mrb[103].mxu0  ;;  %v3789_v60 = vpop.f32.mrb[103].mxu1  ;;  %v2576_v28 = vsel %vm2487_vm5, %v2566_v61, %v2575_v8  ;;  %v2580_v55 = vrot.slane %v2578_v47, 2 }
 0x1e8   :  { %4063 = vmatmul.mubr.bf16.gmra.mrb[208].mxu1 %v2567_v17  ;;  %4127 = vmatmul.mubr.bf16.gmra.mrb[208].mxu0 %v2862_v46  ;;  %v2584_v61 = vor.u32 %v2583_v59, %v2580_v55 }
 0x1e9   :  { %4066 = vmatprep.mubr.msk.bf16.mxu1 %vm4385_vm0, %v4384_v0  ;;  %4130 = vmatprep.mubr.msk.bf16.mxu0 %vm4385_vm0, %v4384_v0 }
 0x1ea   :  { %v2585_v15 = vsel %vm2487_vm5, %v2575_v8, %v2584_v61  ;;  %v2867_v8 = vrot.slane %v4981_v1, 3 }
 0x1eb   :  { %v1411_v27 = vpop.f32.mrb[104].mxu1  ;;  %v1763_v43 = vpop.f32.mrb[104].mxu0 }
 0x1ec   :  { %v1471_v51 = vadd.f32 %v1411_v27, %v4977_v37  ;;  %v5158_v38 = vadd.f32 %v1763_v43, %v1469_v20  ;;  %v3792_v19 = vpop.f32.mrb[105].mxu1  ;;  %v3856_v16 = vpop.f32.mrb[105].mxu0  ;;  %v2466_v37 = vld [vmem:[#allocation2 + $0x6c] sm:$0x7]  ;;  %v2868_v55 = vsel %vm2847_vm6, %v2865_v56, %v2867_v8 }
 0x1ed   :  { %v1414_v24 = vpop.f32.mrb[106].mxu1  ;;  %v1766_v29 = vpop.f32.mrb[106].mxu0  ;;  %v5173_v2 = vcombine.low %v5008_v63, %v2466_v37 }
 0x1ee   :  { %v1472_v50 = vadd.f32 %v1414_v24, %v4984_v48  ;;  %v5163_v39 = vadd.f32 %v1766_v29, %v1470_v4  ;;  %v3857_v13 = vpop.f32.mrb[107].mxu0  ;;  %v3793_v31 = vpop.f32.mrb[107].mxu1  ;;  %v2590_v48 = vshll.u32 %v4997_v23, 16  ;;  %v2589_v4 = vrot.slane %v2587_v45, 2 }
 0x1ef   :  { %v2596_v54 = vshrl.u32 %v5173_v2, 16  ;;  %v2599_v27 = vshll.u32 %v5173_v2, 16 }
 0x1f0   :  { %4067 = vmatmul.mubr.bf16.gmra.mrb[212].mxu1 %v2576_v28  ;;  %4131 = vmatmul.mubr.bf16.gmra.mrb[212].mxu0 %v2864_v34  ;;  %v2592_v62 = vrot.slane %v2590_v48, 3 }
 0x1f1   :  { %4070 = vmatprep.mubr.msk.bf16.mxu1 %vm4385_vm0, %v4384_v0  ;;  %4134 = vmatprep.mubr.msk.bf16.mxu0 %vm4385_vm0, %v4384_v0  ;;  %v2598_v59 = vrot.slane %v2596_v54, 2  ;;  %v2601_v1 = vrot.slane %v2599_v27, 3 }
 0x1f3   :  { %v1419_v22 = vpop.f32.mrb[108].mxu1  ;;  %v1771_v20 = vpop.f32.mrb[108].mxu0 }
 0x1f4   :  { %v1473_v18 = vadd.f32 %v1419_v22, %v4993_v41  ;;  %v5176_v33 = vadd.f32 %v1771_v20, %v1471_v51  ;;  %v3796_v32 = vpop.f32.mrb[109].mxu1  ;;  %v3860_v17 = vpop.f32.mrb[109].mxu0  ;;  %v2593_v41 = vor.u32 %v2592_v62, %v2589_v4 }
 0x1f5   :  { %v1422_v46 = vpop.f32.mrb[110].mxu1  ;;  %v1774_v11 = vpop.f32.mrb[110].mxu0 }
 0x1f6   :  { %v1474_v60 = vadd.f32 %v1422_v46, %v5000_v7  ;;  %v5181_v47 = vadd.f32 %v1774_v11, %v1472_v50  ;;  %v3861_v63 = vpop.f32.mrb[111].mxu0  ;;  %v3797_v52 = vpop.f32.mrb[111].mxu1  ;;  %v2594_v34 = vsel %vm2487_vm5, %v2584_v61, %v2593_v41  ;;  %v2869_v61 = vrot.slane %v4997_v23, 3 }
 0x1f8   :  { %4071 = vmatmul.mubr.bf16.gmra.mrb[216].mxu1 %v2585_v15  ;;  %4135 = vmatmul.mubr.bf16.gmra.mrb[216].mxu0 %v2866_v25  ;;  %v2870_v46 = vsel %vm2847_vm6, %v2867_v8, %v2869_v61 }
 0x1f9   :  { %4074 = vmatprep.mubr.msk.bf16.mxu1 %vm4385_vm0, %v4384_v0  ;;  %4138 = vmatprep.mubr.msk.bf16.mxu0 %vm4385_vm0, %v4384_v0 }
 0x1fb   :  { %v1427_v7 = vpop.f32.mrb[112].mxu1  ;;  %v1779_v43 = vpop.f32.mrb[112].mxu0 }
 0x1fc   :  { %v1475_v51 = vadd.f32 %v1427_v7, %v5011_v3  ;;  %v5191_v19 = vadd.f32 %v1779_v43, %v1473_v18  ;;  %v3800_v16 = vpop.f32.mrb[113].mxu1  ;;  %v3864_v24 = vpop.f32.mrb[113].mxu0  ;;  %v2602_v3 = vor.u32 %v2601_v1, %v2598_v59 }
 0x1fd   :  { %v1430_v29 = vpop.f32.mrb[114].mxu1  ;;  %v1782_v28 = vpop.f32.mrb[114].mxu0 }
 0x1fe   :  { %v1476_v50 = vadd.f32 %v1430_v29, %v5017_v10  ;;  %v5196_v13 = vadd.f32 %v1782_v28, %v1474_v60  ;;  %v3865_v31 = vpop.f32.mrb[115].mxu0  ;;  %v3801_v37 = vpop.f32.mrb[115].mxu1  ;;  %v2603_v17 = vsel %vm2487_vm5, %v2593_v41, %v2602_v3 }
 0x200   :  { %4075 = vmatmul.mubr.bf16.gmra.mrb[220].mxu1 %v2594_v34  ;;  %4139 = vmatmul.mubr.bf16.gmra.mrb[220].mxu0 %v2868_v55 }
 0x201   :  { %4078 = vmatprep.mubr.msk.bf16.mxu1 %vm4385_vm0, %v4384_v0  ;;  %4142 = vmatprep.mubr.msk.bf16.mxu0 %vm4385_vm0, %v4384_v0 }
 0x203   :  { %v1435_v56 = vpop.f32.mrb[116].mxu1  ;;  %v1787_v45 = vpop.f32.mrb[116].mxu0 }
 0x204   :  { %v1477_v48 = vadd.f32 %v1435_v56, %v5028_v26  ;;  %v5204_v10 = vadd.f32 %v1787_v45, %v1475_v51  ;;  %v3804_v22 = vpop.f32.mrb[117].mxu1  ;;  %v3868_v20 = vpop.f32.mrb[117].mxu0  ;;  %v2871_v26 = vrot.slane %v5173_v2, 3 }
 0x205   :  { %v1438_v18 = vpop.f32.mrb[118].mxu1  ;;  %v1790_v32 = vpop.f32.mrb[118].mxu0 }
 0x206   :  { %v1478_v11 = vadd.f32 %v1438_v18, %v5032_v40  ;;  %v5209_v15 = vadd.f32 %v1790_v32, %v1476_v50  ;;  %v3869_v25 = vpop.f32.mrb[119].mxu0  ;;  %v3805_v23 = vpop.f32.mrb[119].mxu1  ;;  %v2872_v54 = vsel %vm2847_vm6, %v2869_v61, %v2871_v26 }
 0x208   :  { %4079 = vmatmul.mubr.bf16.gmra.mrb[224].mxu1 %v2603_v17  ;;  %4143 = vmatmul.mubr.bf16.gmra.mrb[224].mxu0 %v2870_v46 }
 0x209   :  { %4082 = vmatprep.mubr.msk.bf16.mxu1 %vm4385_vm0, %v4384_v0  ;;  %4146 = vmatprep.mubr.msk.bf16.mxu0 %vm4385_vm0, %v4384_v0 }
 0x20b   :  { %v1443_v4 = vpop.f32.mrb[120].mxu1  ;;  %v1795_v62 = vpop.f32.mrb[120].mxu0 }
 0x20c   :  { %v1479_v60 = vadd.f32 %v1443_v4, %v5041_v57  ;;  %v5217_v63 = vadd.f32 %v1795_v62, %v1477_v48  ;;  %v3808_v40 = vpop.f32.mrb[121].mxu1  ;;  %v3872_v52 = vpop.f32.mrb[121].mxu0 }
 0x20d   :  { %v1446_v41 = vpop.f32.mrb[122].mxu1  ;;  %v1798_v8 = vpop.f32.mrb[122].mxu0 }
 0x20e   :  { %v1480_v27 = vadd.f32 %v1446_v41, %v5045_v9  ;;  %v5221_v7 = vadd.f32 %v1798_v8, %v1478_v11  ;;  %v3873_v43 = vpop.f32.mrb[123].mxu0  ;;  %v3809_v51 = vpop.f32.mrb[123].mxu1 }
 0x210   :  { %4083 = vmatmul.mubr.bf16.gmra.mrb[228].mxu1 %v2602_v3  ;;  %4147 = vmatmul.mubr.bf16.gmra.mrb[228].mxu0 %v2872_v54 }
 0x211   :  { %4150 = vmatprep.mubr.msk.bf16.mxu0 %vm4385_vm0, %v4384_v0 }
 0x213   :  { %v1451_v57 = vpop.f32.mrb[124].mxu1  ;;  %v1803_v2 = vpop.f32.mrb[124].mxu0 }
 0x214   :  { %v1481_v16 = vadd.f32 %v1451_v57, %v5054_v30  ;;  %v5226_v24 = vadd.f32 %v1803_v2, %v1479_v60  ;;  %v3876_v29 = vpop.f32.mrb[125].mxu0  ;;  %v3812_v28 = vpop.f32.mrb[125].mxu1 }
 0x215   :  { %v1806_v34 = vpop.f32.mrb[126].mxu0  ;;  %v1454_v55 = vpop.f32.mrb[126].mxu1 }
 0x216   :  { %v5228_v9 = vadd.f32 %v1806_v34, %v1480_v27  ;;  %v3877_v59 = vpop.f32.mrb[127].mxu0  ;;  %v3813_v1 = vpop.f32.mrb[127].mxu1 }
 0x218   :  { %4151 = vmatmul.mubr.bf16.gmra.mrb[232].mxu0 %v2871_v26 }
 0x21b   :  { %v1811_v50 = vpop.f32.mrb[128].mxu0  ;;  %v1984_v31 = vpop.f32.mrb[128].mxu1 }
 0x21c   :  { %v5230_v37 = vadd.f32 %v1811_v50, %v1481_v16  ;;  %v2086_v0 = vadd.f32 %v1984_v31, %v5068_v53  ;;  %v3880_v3 = vpop.f32.mrb[129].mxu0  ;;  %v3900_v61 = vpop.f32.mrb[129].mxu1 }
 0x21d   :  { %v1814_v30 = vpop.f32.mrb[130].mxu0  ;;  %v1987_v56 = vpop.f32.mrb[130].mxu1 }
 0x21e   :  { %v2087_v45 = vadd.f32 %v1987_v56, %v5073_v58  ;;  %v3881_v48 = vpop.f32.mrb[131].mxu0  ;;  %v3901_v22 = vpop.f32.mrb[131].mxu1 }
 0x223   :  { %v1992_v20 = vpop.f32.mrb[132].mxu1  ;;  %v2339_v18 = vpop.f32.mrb[132].mxu0 }
 0x224   :  { %v2088_v32 = vadd.f32 %v1992_v20, %v5083_v12  ;;  %v5235_v17 = vadd.f32 %v2339_v18, %v2086_v0  ;;  %v3904_v46 = vpop.f32.mrb[133].mxu1  ;;  %v3968_v11 = vpop.f32.mrb[133].mxu0 }
 0x225   :  { %v1995_v25 = vpop.f32.mrb[134].mxu1  ;;  %v2342_v23 = vpop.f32.mrb[134].mxu0 }
 0x226   :  { %v2089_v53 = vadd.f32 %v1995_v25, %v5088_v21  ;;  %v5238_v26 = vadd.f32 %v2342_v23, %v2087_v45  ;;  %v3969_v4 = vpop.f32.mrb[135].mxu0  ;;  %v3905_v62 = vpop.f32.mrb[135].mxu1 }
 0x22b   :  { %v2000_v60 = vpop.f32.mrb[136].mxu1  ;;  %v2347_v58 = vpop.f32.mrb[136].mxu0 }
 0x22c   :  { %v2090_v40 = vadd.f32 %v2000_v60, %v5098_v42  ;;  %v5241_v52 = vadd.f32 %v2347_v58, %v2088_v32  ;;  %v3908_v41 = vpop.f32.mrb[137].mxu1  ;;  %v3972_v12 = vpop.f32.mrb[137].mxu0 }
 0x22d   :  { %v2003_v8 = vpop.f32.mrb[138].mxu1  ;;  %v2350_v54 = vpop.f32.mrb[138].mxu0 }
 0x22e   :  { %v2091_v27 = vadd.f32 %v2003_v8, %v5103_v49  ;;  %v5244_v43 = vadd.f32 %v2350_v54, %v2089_v53  ;;  %v3973_v51 = vpop.f32.mrb[139].mxu0  ;;  %v3909_v21 = vpop.f32.mrb[139].mxu1 }
 0x233   :  { %v2008_v57 = vpop.f32.mrb[140].mxu1  ;;  %v2355_v2 = vpop.f32.mrb[140].mxu0 }
 0x234   :  { %v2092_v16 = vadd.f32 %v2008_v57, %v5113_v5  ;;  %v5247_v29 = vadd.f32 %v2355_v2, %v2090_v40  ;;  %v3912_v28 = vpop.f32.mrb[141].mxu1  ;;  %v3976_v42 = vpop.f32.mrb[141].mxu0 }
 0x235   :  { %v2011_v34 = vpop.f32.mrb[142].mxu1  ;;  %v2358_v55 = vpop.f32.mrb[142].mxu0 }
 0x236   :  { %v2093_v59 = vadd.f32 %v2011_v34, %v5118_v6  ;;  %v5250_v1 = vadd.f32 %v2358_v55, %v2091_v27  ;;  %v3977_v50 = vpop.f32.mrb[143].mxu0  ;;  %v3913_v49 = vpop.f32.mrb[143].mxu1 }
 0x23b   :  { %v2016_v31 = vpop.f32.mrb[144].mxu1  ;;  %v2363_v0 = vpop.f32.mrb[144].mxu0 }
 0x23c   :  { %v2094_v3 = vadd.f32 %v2016_v31, %v5128_v14  ;;  %v5253_v61 = vadd.f32 %v2363_v0, %v2092_v16  ;;  %v3916_v30 = vpop.f32.mrb[145].mxu1  ;;  %v3980_v5 = vpop.f32.mrb[145].mxu0 }
 0x23d   :  { %v2019_v56 = vpop.f32.mrb[146].mxu1  ;;  %v2366_v45 = vpop.f32.mrb[146].mxu0 }
 0x23e   :  { %v2095_v48 = vadd.f32 %v2019_v56, %v5133_v44  ;;  %v5256_v22 = vadd.f32 %v2366_v45, %v2093_v59  ;;  %v3981_v20 = vpop.f32.mrb[147].mxu0  ;;  %v3917_v6 = vpop.f32.mrb[147].mxu1 }
 0x243   :  { %v2024_v18 = vpop.f32.mrb[148].mxu1  ;;  %v2371_v32 = vpop.f32.mrb[148].mxu0 }
 0x244   :  { %v2096_v46 = vadd.f32 %v2024_v18, %v5143_v35  ;;  %v5259_v11 = vadd.f32 %v2371_v32, %v2094_v3  ;;  %v3920_v25 = vpop.f32.mrb[149].mxu1  ;;  %v3984_v14 = vpop.f32.mrb[149].mxu0 }
 0x245   :  { %v2027_v23 = vpop.f32.mrb[150].mxu1  ;;  %v2374_v53 = vpop.f32.mrb[150].mxu0 }
 0x246   :  { %v2097_v4 = vadd.f32 %v2027_v23, %v5148_v36  ;;  %v5262_v62 = vadd.f32 %v2374_v53, %v2095_v48  ;;  %v3985_v60 = vpop.f32.mrb[151].mxu0  ;;  %v3921_v44 = vpop.f32.mrb[151].mxu1 }
 0x24b   :  { %v2032_v58 = vpop.f32.mrb[152].mxu1  ;;  %v2379_v40 = vpop.f32.mrb[152].mxu0 }
 0x24c   :  { %v2098_v41 = vadd.f32 %v2032_v58, %v5158_v38  ;;  %v5265_v12 = vadd.f32 %v2379_v40, %v2096_v46  ;;  %v3924_v8 = vpop.f32.mrb[153].mxu1  ;;  %v3988_v35 = vpop.f32.mrb[153].mxu0 }
 0x24d   :  { %v2035_v54 = vpop.f32.mrb[154].mxu1  ;;  %v2382_v27 = vpop.f32.mrb[154].mxu0 }
 0x24e   :  { %v2099_v51 = vadd.f32 %v2035_v54, %v5163_v39  ;;  %v5268_v21 = vadd.f32 %v2382_v27, %v2097_v4  ;;  %v3989_v57 = vpop.f32.mrb[155].mxu0  ;;  %v3925_v36 = vpop.f32.mrb[155].mxu1 }
 0x253   :  { %v2040_v2 = vpop.f32.mrb[156].mxu1  ;;  %v2387_v16 = vpop.f32.mrb[156].mxu0 }
 0x254   :  { %v2100_v28 = vadd.f32 %v2040_v2, %v5176_v33  ;;  %v5271_v42 = vadd.f32 %v2387_v16, %v2098_v41  ;;  %v3928_v34 = vpop.f32.mrb[157].mxu1  ;;  %v3992_v38 = vpop.f32.mrb[157].mxu0 }
 0x255   :  { %v2043_v55 = vpop.f32.mrb[158].mxu1  ;;  %v2390_v59 = vpop.f32.mrb[158].mxu0 }
 0x256   :  { %v2101_v50 = vadd.f32 %v2043_v55, %v5181_v47  ;;  %v5274_v49 = vadd.f32 %v2390_v59, %v2099_v51  ;;  %v3993_v31 = vpop.f32.mrb[159].mxu0  ;;  %v3929_v39 = vpop.f32.mrb[159].mxu1 }
 0x25b   :  { %v2048_v0 = vpop.f32.mrb[160].mxu1  ;;  %v2395_v3 = vpop.f32.mrb[160].mxu0 }
 0x25c   :  { %v2102_v30 = vadd.f32 %v2048_v0, %v5191_v19  ;;  %v5277_v5 = vadd.f32 %v2395_v3, %v2100_v28  ;;  %v3932_v56 = vpop.f32.mrb[161].mxu1  ;;  %v3996_v33 = vpop.f32.mrb[161].mxu0 }
 0x25d   :  { %v2051_v45 = vpop.f32.mrb[162].mxu1  ;;  %v2398_v48 = vpop.f32.mrb[162].mxu0 }
 0x25e   :  { %v2103_v20 = vadd.f32 %v2051_v45, %v5196_v13  ;;  %v5280_v6 = vadd.f32 %v2398_v48, %v2101_v50  ;;  %v3997_v18 = vpop.f32.mrb[163].mxu0  ;;  %v3933_v47 = vpop.f32.mrb[163].mxu1 }
 0x263   :  { %v2056_v32 = vpop.f32.mrb[164].mxu1  ;;  %v2403_v46 = vpop.f32.mrb[164].mxu0 }
 0x264   :  { %v2104_v25 = vadd.f32 %v2056_v32, %v5204_v10  ;;  %v5283_v14 = vadd.f32 %v2403_v46, %v2102_v30  ;;  %v3936_v23 = vpop.f32.mrb[165].mxu1  ;;  %v4000_v19 = vpop.f32.mrb[165].mxu0 }
 0x265   :  { %v2059_v53 = vpop.f32.mrb[166].mxu1  ;;  %v2406_v4 = vpop.f32.mrb[166].mxu0 }
 0x266   :  { %v2105_v60 = vadd.f32 %v2059_v53, %v5209_v15  ;;  %v5286_v44 = vadd.f32 %v2406_v4, %v2103_v20  ;;  %v4001_v58 = vpop.f32.mrb[167].mxu0  ;;  %v3937_v13 = vpop.f32.mrb[167].mxu1 }
 0x26b   :  { %v2064_v40 = vpop.f32.mrb[168].mxu1  ;;  %v2411_v41 = vpop.f32.mrb[168].mxu0 }
 0x26c   :  { %v2106_v8 = vadd.f32 %v2064_v40, %v5217_v63  ;;  %v5289_v35 = vadd.f32 %v2411_v41, %v2104_v25  ;;  %v3940_v54 = vpop.f32.mrb[169].mxu1  ;;  %v4004_v10 = vpop.f32.mrb[169].mxu0 }
 0x26d   :  { %v2067_v27 = vpop.f32.mrb[170].mxu1  ;;  %v2414_v51 = vpop.f32.mrb[170].mxu0 }
 0x26e   :  { %v2107_v57 = vadd.f32 %v2067_v27, %v5221_v7  ;;  %v5292_v36 = vadd.f32 %v2414_v51, %v2105_v60  ;;  %v4005_v2 = vpop.f32.mrb[171].mxu0  ;;  %v3941_v15 = vpop.f32.mrb[171].mxu1 }
 0x273   :  { %v2072_v16 = vpop.f32.mrb[172].mxu1  ;;  %v2419_v28 = vpop.f32.mrb[172].mxu0 }
 0x274   :  { %v2108_v34 = vadd.f32 %v2072_v16, %v5226_v24  ;;  %v5295_v38 = vadd.f32 %v2419_v28, %v2106_v8  ;;  %v3944_v55 = vpop.f32.mrb[173].mxu1  ;;  %v4008_v63 = vpop.f32.mrb[173].mxu0  ;;  %v5312_v8 = vld [vmem:[%s5376_s2] ss:$0 sm:$0xff]  ;;  %s4386_s2 = smov [#allocation7]  }
 0x275   :  { %v2075_v59 = vpop.f32.mrb[174].mxu1  ;;  %v2422_v50 = vpop.f32.mrb[174].mxu0  ;;  %s3210_s11 = sshll.u32 %s4386_s2, 4  ;;  %s3211_s11 = int_to_ptr.vmem [resolvable:$true] %s3210_s11 }
 0x276   :  { %v2109_v31 = vadd.f32 %v2075_v59, %v5228_v9  ;;  %v5298_v39 = vadd.f32 %v2422_v50, %v2107_v57  ;;  %v4009_v0 = vpop.f32.mrb[175].mxu0  ;;  %v3945_v7 = vpop.f32.mrb[175].mxu1  ;;  %s4352_s12 = scalar_lea.vmem %s3211_s11, 3200  ;;  %p4357_p3 = scmp.lt.s32.totalorder %s3211_s11, %s3211_s11 }
 0x277   :  { %p4353_p2 = scmp.ne.s32.totalorder %s3211_s11, %s4352_s12  ;;  %p4358_p4 = scmp.lt.s32.totalorder %s4352_s12, %s4352_s12 }
 0x279   :  { %p4359_p5 = por %p4358_p4, %p4357_p3 }
 0x27b   :  { %v2080_v3 = vpop.f32.mrb[176].mxu1  ;;  %v2427_v30 = vpop.f32.mrb[176].mxu0  ;;  %p4360_p6 = pnand %p4359_p5, %p4353_p2 }
 0x27c   :  { %v2110_v56 = vadd.f32 %v2080_v3, %v5230_v37  ;;  %v5301_v33 = vadd.f32 %v2427_v30, %v2108_v34  ;;  %v4012_v45 = vpop.f32.mrb[177].mxu0  ;;  %v3948_v24 = vpop.f32.mrb[177].mxu1 }
 0x27d   :  { %v2430_v48 = vpop.f32.mrb[178].mxu0  ;;  %v2083_v20 = vpop.f32.mrb[178].mxu1 }
 0x27e   :  { %v5303_v18 = vadd.f32 %v2430_v48, %v2109_v31  ;;  %v4013_v47 = vpop.f32.mrb[179].mxu0  ;;  %v3949_v32 = vpop.f32.mrb[179].mxu1 }
 0x283   :  { %v2435_v46 = vpop.f32.mrb[180].mxu0  ;;  %v2699_v9 = vpop.f32.mrb[180].mxu1 }
 0x284   :  { %v5305_v25 = vadd.f32 %v2435_v46, %v2110_v56  ;;  %v2801_v23 = vadd.f32 %v2699_v9, %v5235_v17  ;;  %v4016_v19 = vpop.f32.mrb[181].mxu0  ;;  %v4036_v53 = vpop.f32.mrb[181].mxu1 }
 0x285   :  { %v2438_v4 = vpop.f32.mrb[182].mxu0  ;;  %v2702_v37 = vpop.f32.mrb[182].mxu1 }
 0x286   :  { %v2802_v60 = vadd.f32 %v2702_v37, %v5238_v26  ;;  %v4017_v58 = vpop.f32.mrb[183].mxu0  ;;  %v4037_v13 = vpop.f32.mrb[183].mxu1 }
 0x28b   :  { %v2707_v40 = vpop.f32.mrb[184].mxu1  ;;  %v2968_v41 = vpop.f32.mrb[184].mxu0 }
 0x28c   :  { %v2803_v54 = vadd.f32 %v2707_v40, %v5241_v52  ;;  %v3070_v10 = vadd.f32 %v2968_v41, %v2801_v23  ;;  %v4040_v27 = vpop.f32.mrb[185].mxu1  ;;  %v4104_v17 = vpop.f32.mrb[185].mxu0 }
 0x28d   :  { %v2710_v51 = vpop.f32.mrb[186].mxu1  ;;  %v2971_v57 = vpop.f32.mrb[186].mxu0 }
 0x28e   :  { %v3155_v2 = vadd.f32 %v5312_v8, %v3070_v10  ;;  %v2804_v26 = vadd.f32 %v2710_v51, %v5244_v43  ;;  %v3071_v15 = vadd.f32 %v2971_v57, %v2802_v60  ;;  %v4105_v16 = vpop.f32.mrb[187].mxu0  ;;  %v4041_v28 = vpop.f32.mrb[187].mxu1 }
 0x290   :  { %3180 = vst [vmem:[#allocation7] sm:$0xff] %v3155_v2  ;;  %v3156_v34 = vadd.f32 %v5312_v8, %v3071_v15 }
 0x292   :  { %3181 = vst [vmem:[#allocation7 + $0x8] sm:$0xff] %v3156_v34 }
 0x293   :  { %v2715_v55 = vpop.f32.mrb[188].mxu1  ;;  %v2976_v63 = vpop.f32.mrb[188].mxu0 }
 0x294   :  { %v2805_v52 = vadd.f32 %v2715_v55, %v5247_v29  ;;  %v3072_v59 = vadd.f32 %v2976_v63, %v2803_v54  ;;  %v4044_v50 = vpop.f32.mrb[189].mxu1  ;;  %v4108_v31 = vpop.f32.mrb[189].mxu0 }
 0x295   :  { %v2718_v0 = vpop.f32.mrb[190].mxu1  ;;  %v2979_v7 = vpop.f32.mrb[190].mxu0 }
 0x296   :  { %v3157_v3 = vadd.f32 %v5312_v8, %v3072_v59  ;;  %v2806_v43 = vadd.f32 %v2718_v0, %v5250_v1  ;;  %v3073_v30 = vadd.f32 %v2979_v7, %v2804_v26  ;;  %v4109_v56 = vpop.f32.mrb[191].mxu0  ;;  %v4045_v45 = vpop.f32.mrb[191].mxu1 }
 0x298   :  { %3182 = vst [vmem:[#allocation7 + $0x10] sm:$0xff] %v3157_v3  ;;  %v3158_v24 = vadd.f32 %v5312_v8, %v3073_v30 }
 0x29a   :  { %3183 = vst [vmem:[#allocation7 + $0x18] sm:$0xff] %v3158_v24 }
 0x29b   :  { %v2723_v48 = vpop.f32.mrb[192].mxu1  ;;  %v2984_v20 = vpop.f32.mrb[192].mxu0 }
 0x29c   :  { %v2807_v29 = vadd.f32 %v2723_v48, %v5253_v61  ;;  %v3074_v47 = vadd.f32 %v2984_v20, %v2805_v52  ;;  %v4048_v32 = vpop.f32.mrb[193].mxu1  ;;  %v4112_v46 = vpop.f32.mrb[193].mxu0 }
 0x29d   :  { %v2726_v9 = vpop.f32.mrb[194].mxu1  ;;  %v2987_v23 = vpop.f32.mrb[194].mxu0 }
 0x29e   :  { %v3159_v19 = vadd.f32 %v5312_v8, %v3074_v47  ;;  %v2808_v1 = vadd.f32 %v2726_v9, %v5256_v22  ;;  %v3075_v53 = vadd.f32 %v2987_v23, %v2806_v43  ;;  %v4113_v4 = vpop.f32.mrb[195].mxu0  ;;  %v4049_v37 = vpop.f32.mrb[195].mxu1 }
 0x2a0   :  { %3184 = vst [vmem:[#allocation7 + $0x20] sm:$0xff] %v3159_v19  ;;  %v3160_v60 = vadd.f32 %v5312_v8, %v3075_v53 }
 0x2a2   :  { %3185 = vst [vmem:[#allocation7 + $0x28] sm:$0xff] %v3160_v60 }
 0x2a3   :  { %v2731_v58 = vpop.f32.mrb[196].mxu1  ;;  %v2992_v13 = vpop.f32.mrb[196].mxu0 }
 0x2a4   :  { %v2809_v61 = vadd.f32 %v2731_v58, %v5259_v11  ;;  %v3076_v40 = vadd.f32 %v2992_v13, %v2807_v29  ;;  %v4052_v41 = vpop.f32.mrb[197].mxu1  ;;  %v4116_v54 = vpop.f32.mrb[197].mxu0 }
 0x2a5   :  { %v2734_v10 = vpop.f32.mrb[198].mxu1  ;;  %v2995_v27 = vpop.f32.mrb[198].mxu0 }
 0x2a6   :  { %v3161_v17 = vadd.f32 %v5312_v8, %v3076_v40  ;;  %v2810_v22 = vadd.f32 %v2734_v10, %v5262_v62  ;;  %v3077_v51 = vadd.f32 %v2995_v27, %v2808_v1  ;;  %v4117_v57 = vpop.f32.mrb[199].mxu0  ;;  %v4053_v2 = vpop.f32.mrb[199].mxu1 }
 0x2a8   :  { %3186 = vst [vmem:[#allocation7 + $0x30] sm:$0xff] %v3161_v17  ;;  %v3162_v26 = vadd.f32 %v5312_v8, %v3077_v51 }
 0x2aa   :  { %3187 = vst [vmem:[#allocation7 + $0x38] sm:$0xff] %v3162_v26 }
 0x2ab   :  { %v2739_v15 = vpop.f32.mrb[200].mxu1  ;;  %v3000_v16 = vpop.f32.mrb[200].mxu0 }
 0x2ac   :  { %v2811_v11 = vadd.f32 %v2739_v15, %v5265_v12  ;;  %v3078_v28 = vadd.f32 %v3000_v16, %v2809_v61  ;;  %v4056_v34 = vpop.f32.mrb[201].mxu1  ;;  %v4120_v55 = vpop.f32.mrb[201].mxu0 }
 0x2ad   :  { %v2742_v63 = vpop.f32.mrb[202].mxu1  ;;  %v3003_v52 = vpop.f32.mrb[202].mxu0 }
 0x2ae   :  { %v3163_v59 = vadd.f32 %v5312_v8, %v3078_v28  ;;  %v2812_v62 = vadd.f32 %v2742_v63, %v5268_v21  ;;  %v3079_v50 = vadd.f32 %v3003_v52, %v2810_v22  ;;  %v4121_v31 = vpop.f32.mrb[203].mxu0  ;;  %v4057_v0 = vpop.f32.mrb[203].mxu1 }
 0x2b0   :  { %3188 = vst [vmem:[#allocation7 + $0x40] sm:$0xff] %v3163_v59  ;;  %v3164_v7 = vadd.f32 %v5312_v8, %v3079_v50 }
 0x2b2   :  { %3189 = vst [vmem:[#allocation7 + $0x48] sm:$0xff] %v3164_v7 }
 0x2b3   :  { %v2747_v3 = vpop.f32.mrb[204].mxu1  ;;  %v3008_v43 = vpop.f32.mrb[204].mxu0 }
 0x2b4   :  { %v2813_v12 = vadd.f32 %v2747_v3, %v5271_v42  ;;  %v3080_v30 = vadd.f32 %v3008_v43, %v2811_v11  ;;  %v4060_v56 = vpop.f32.mrb[205].mxu1  ;;  %v4124_v45 = vpop.f32.mrb[205].mxu0 }
 0x2b5   :  { %v2750_v24 = vpop.f32.mrb[206].mxu1  ;;  %v3011_v48 = vpop.f32.mrb[206].mxu0 }
 0x2b6   :  { %v3165_v20 = vadd.f32 %v5312_v8, %v3080_v30  ;;  %v2814_v21 = vadd.f32 %v2750_v24, %v5274_v49  ;;  %v3081_v29 = vadd.f32 %v3011_v48, %v2812_v62  ;;  %v4125_v47 = vpop.f32.mrb[207].mxu0  ;;  %v4061_v32 = vpop.f32.mrb[207].mxu1 }
 0x2b8   :  { %3190 = vst [vmem:[#allocation7 + $0x50] sm:$0xff] %v3165_v20  ;;  %v3166_v46 = vadd.f32 %v5312_v8, %v3081_v29 }
 0x2ba   :  { %3191 = vst [vmem:[#allocation7 + $0x58] sm:$0xff] %v3166_v46 }
 0x2bb   :  { %v2755_v9 = vpop.f32.mrb[208].mxu1  ;;  %v3016_v23 = vpop.f32.mrb[208].mxu0 }
 0x2bc   :  { %v2815_v42 = vadd.f32 %v2755_v9, %v5277_v5  ;;  %v3082_v19 = vadd.f32 %v3016_v23, %v2813_v12  ;;  %v4064_v1 = vpop.f32.mrb[209].mxu1  ;;  %v4128_v53 = vpop.f32.mrb[209].mxu0 }
 0x2bd   :  { %v2758_v4 = vpop.f32.mrb[210].mxu1  ;;  %v3019_v37 = vpop.f32.mrb[210].mxu0 }
 0x2be   :  { %v3167_v60 = vadd.f32 %v5312_v8, %v3082_v19  ;;  %v2816_v49 = vadd.f32 %v2758_v4, %v5280_v6  ;;  %v3083_v58 = vadd.f32 %v3019_v37, %v2814_v21  ;;  %v4129_v13 = vpop.f32.mrb[211].mxu0  ;;  %v4065_v61 = vpop.f32.mrb[211].mxu1 }
 0x2c0   :  { %3192 = vst [vmem:[#allocation7 + $0x60] sm:$0xff] %v3167_v60  ;;  %v3168_v40 = vadd.f32 %v5312_v8, %v3083_v58 }
 0x2c2   :  { %3193 = vst [vmem:[#allocation7 + $0x68] sm:$0xff] %v3168_v40 }
 0x2c3   :  { %v2763_v41 = vpop.f32.mrb[212].mxu1  ;;  %v3024_v54 = vpop.f32.mrb[212].mxu0 }
 0x2c4   :  { %v2817_v5 = vadd.f32 %v2763_v41, %v5283_v14  ;;  %v3084_v10 = vadd.f32 %v3024_v54, %v2815_v42  ;;  %v4068_v27 = vpop.f32.mrb[213].mxu1  ;;  %v4132_v17 = vpop.f32.mrb[213].mxu0 }
 0x2c5   :  { %v2766_v22 = vpop.f32.mrb[214].mxu1  ;;  %v3027_v51 = vpop.f32.mrb[214].mxu0 }
 0x2c6   :  { %v3169_v57 = vadd.f32 %v5312_v8, %v3084_v10  ;;  %v2818_v6 = vadd.f32 %v2766_v22, %v5286_v44  ;;  %v3085_v2 = vadd.f32 %v3027_v51, %v2816_v49  ;;  %v4133_v26 = vpop.f32.mrb[215].mxu0  ;;  %v4069_v15 = vpop.f32.mrb[215].mxu1 }
 0x2c8   :  { %3194 = vst [vmem:[#allocation7 + $0x70] sm:$0xff] %v3169_v57  ;;  %v3170_v16 = vadd.f32 %v5312_v8, %v3085_v2 }
 0x2ca   :  { %3195 = vst [vmem:[#allocation7 + $0x78] sm:$0xff] %v3170_v16 }
 0x2cb   :  { %v2771_v11 = vpop.f32.mrb[216].mxu1  ;;  %v3032_v28 = vpop.f32.mrb[216].mxu0 }
 0x2cc   :  { %v2819_v14 = vadd.f32 %v2771_v11, %v5289_v35  ;;  %v3086_v34 = vadd.f32 %v3032_v28, %v2817_v5  ;;  %v4072_v55 = vpop.f32.mrb[217].mxu1  ;;  %v4136_v63 = vpop.f32.mrb[217].mxu0 }
 0x2cd   :  { %v2774_v52 = vpop.f32.mrb[218].mxu1  ;;  %v3035_v59 = vpop.f32.mrb[218].mxu0 }
 0x2ce   :  { %v3171_v62 = vadd.f32 %v5312_v8, %v3086_v34  ;;  %v2820_v44 = vadd.f32 %v2774_v52, %v5292_v36  ;;  %v3087_v50 = vadd.f32 %v3035_v59, %v2818_v6  ;;  %v4137_v31 = vpop.f32.mrb[219].mxu0  ;;  %v4073_v0 = vpop.f32.mrb[219].mxu1 }
 0x2d0   :  { %3196 = vst [vmem:[#allocation7 + $0x80] sm:$0xff] %v3171_v62  ;;  %v3172_v7 = vadd.f32 %v5312_v8, %v3087_v50 }
 0x2d2   :  { %3197 = vst [vmem:[#allocation7 + $0x88] sm:$0xff] %v3172_v7 }
 0x2d3   :  { %v2779_v3 = vpop.f32.mrb[220].mxu1  ;;  %v3040_v43 = vpop.f32.mrb[220].mxu0 }
 0x2d4   :  { %v2821_v35 = vadd.f32 %v2779_v3, %v5295_v38  ;;  %v3088_v12 = vadd.f32 %v3040_v43, %v2819_v14  ;;  %v4076_v30 = vpop.f32.mrb[221].mxu1  ;;  %v4140_v56 = vpop.f32.mrb[221].mxu0 }
 0x2d5   :  { %v2782_v45 = vpop.f32.mrb[222].mxu1  ;;  %v3043_v24 = vpop.f32.mrb[222].mxu0 }
 0x2d6   :  { %v3173_v48 = vadd.f32 %v5312_v8, %v3088_v12  ;;  %v2822_v36 = vadd.f32 %v2782_v45, %v5298_v39  ;;  %v3089_v20 = vadd.f32 %v3043_v24, %v2820_v44  ;;  %v4141_v21 = vpop.f32.mrb[223].mxu0  ;;  %v4077_v29 = vpop.f32.mrb[223].mxu1 }
 0x2d8   :  { %3198 = vst [vmem:[#allocation7 + $0x90] sm:$0xff] %v3173_v48  ;;  %v3174_v47 = vadd.f32 %v5312_v8, %v3089_v20 }
 0x2da   :  { %3199 = vst [vmem:[#allocation7 + $0x98] sm:$0xff] %v3174_v47 }
 0x2db   :  { %v2787_v32 = vpop.f32.mrb[224].mxu1  ;;  %v3048_v46 = vpop.f32.mrb[224].mxu0 }
 0x2dc   :  { %v2823_v38 = vadd.f32 %v2787_v32, %v5301_v33  ;;  %v3090_v9 = vadd.f32 %v3048_v46, %v2821_v35  ;;  %v4080_v23 = vpop.f32.mrb[225].mxu1  ;;  %v4144_v42 = vpop.f32.mrb[225].mxu0 }
 0x2dd   :  { %v2790_v19 = vpop.f32.mrb[226].mxu1  ;;  %v3051_v1 = vpop.f32.mrb[226].mxu0 }
 0x2de   :  { %v3175_v53 = vadd.f32 %v5312_v8, %v3090_v9  ;;  %v2824_v39 = vadd.f32 %v2790_v19, %v5303_v18  ;;  %v3091_v4 = vadd.f32 %v3051_v1, %v2822_v36  ;;  %v4145_v37 = vpop.f32.mrb[227].mxu0  ;;  %v4081_v60 = vpop.f32.mrb[227].mxu1 }
 0x2e0   :  { %3200 = vst [vmem:[#allocation7 + $0xa0] sm:$0xff] %v3175_v53  ;;  %v3176_v49 = vadd.f32 %v5312_v8, %v3091_v4 }
 0x2e2   :  { %3201 = vst [vmem:[#allocation7 + $0xa8] sm:$0xff] %v3176_v49 }
 0x2e3   :  { %v2795_v58 = vpop.f32.mrb[228].mxu1  ;;  %v3056_v13 = vpop.f32.mrb[228].mxu0 }
 0x2e4   :  { %v2825_v33 = vadd.f32 %v2795_v58, %v5305_v25  ;;  %v3092_v61 = vadd.f32 %v3056_v13, %v2823_v38  ;;  %v4148_v40 = vpop.f32.mrb[229].mxu0  ;;  %v4084_v41 = vpop.f32.mrb[229].mxu1 }
 0x2e5   :  { %v3059_v54 = vpop.f32.mrb[230].mxu0  ;;  %v2798_v5 = vpop.f32.mrb[230].mxu1 }
 0x2e6   :  { %v3177_v10 = vadd.f32 %v5312_v8, %v3092_v61  ;;  %v3093_v27 = vadd.f32 %v3059_v54, %v2824_v39  ;;  %v4149_v18 = vpop.f32.mrb[231].mxu0  ;;  %v4085_v17 = vpop.f32.mrb[231].mxu1 }
 0x2e8   :  { %3202 = vst [vmem:[#allocation7 + $0xb0] sm:$0xff] %v3177_v10  ;;  %v3178_v22 = vadd.f32 %v5312_v8, %v3093_v27 }
 0x2ea   :  { %3203 = vst [vmem:[#allocation7 + $0xb8] sm:$0xff] %v3178_v22 }
 0x2eb   :  { %v3064_v51 = vpop.f32.mrb[232].mxu0 }
 0x2ec   :  { %v3094_v57 = vadd.f32 %v3064_v51, %v2825_v33  ;;  %v4152_v6 = vpop.f32.mrb[233].mxu0 }
 0x2ed   :  { %v3067_v25 = vpop.f32.mrb[234].mxu0 }
 0x2ee   :  { %v3179_v2 = vadd.f32 %v5312_v8, %v3094_v57  ;;  %v4153_v26 = vpop.f32.mrb[235].mxu0 }
 0x2f0   :  { %3204 = vst [vmem:[#allocation7 + $0xc0] sm:$0xff] %v3179_v2 }
 0x2f1   :  { %4363 = shalt.err (!%p4360_p6)
}
 0x2f2   :  { %s4364_s15 = scalar_lea.hbm %s5377_s3, 3200 }
 0x2f3   :  { %p4365_p7 = scmp.ne.s32.totalorder %s5377_s3, %s4364_s15  ;;  %p4368_p8 = scmp.lt.u32.totalorder %s4364_s15, %s5377_s3 }
 0x2f5   :  { %p4370_p9 = pnand %p4368_p8, %p4365_p7 }
 0x2f7   :  { %4373 = shalt.err (!%p4370_p9)
}
 0x2f8   :  { %s4387_s20 = smov 128   ;;  %s4388_s21 = smov 8  }
 0x2f9   :  { %3216 = dma.vmem_to_hbm [thread:$0]  %s3211_s11, 3200, %s5377_s3, [#allocation4], %s4387_s20, %s4387_s20, %s4388_s21  }
 0x2fa   :  { %4378 = dma.done.wait [#allocation4], 3200  }
 0x2fb   :  { %4379 = vsyncadd [#allocation4], 4294964096 }
 0x2fc   :  { %3220 = vsyncpa [#allocation3], 1 }
 0x2fd   :  { %3221 = vsyncpa [#allocation6], 1 }
 0x2fe   :  { %3222 = vsyncpa [#allocation4], 1 }

</bundles_post_ra>
